<compile_context>
chip_gen: v6e
topology: v6e:2x2x1
jax: 0.10.0
libtpu: 0.0.40
codegen_flags: <defaults>
</compile_context>

<pallas_src>
import math
import functools

import jax
import jax.numpy as jnp
from jax.experimental import pallas as pl
from jax.experimental.pallas import tpu as pltpu

# ------------------------- small deterministic "config" -------------------------
NF = 32               # config.model.nf
RW_DEPTH = 4          # config.model.rw_depth
MAX_NODE = 16         # config.data.max_node  (== N here)
DEGREE_MAX = MAX_NODE // 2
EDGE_TH = 0.0         # config.model.edge_th
CENTERED = True       # config.data.centered -> skip the x*2-1 rescale
SIZE_COND = False     # config.model.size_cond
CHANNELS = 1          # config.data.num_channels (asserted == 1 in the module)


def silu(v):          # config.model.nonlinearity == 'swish'
    return v * jax.nn.sigmoid(v)


# ------------------------- Pallas kernel 1: adjacency -> SPD classes -------------------------
def _spd_kernel(x_ref, m_ref, spd_ref, *, n, k_step):
    x = x_ref[0, 0]                                    # [N, N]
    m = m_ref[0, 0]
    adj = jnp.where(x >= 0.0, 1.0, 0.0) * m            # binarized, masked adjacency
    row = jax.lax.broadcasted_iota(jnp.int32, (n, n), 0)
    col = jax.lax.broadcasted_iota(jnp.int32, (n, n), 1)
    off_diag = row != col
    p = adj                                            # binary-adjacency walk counts A^k
    spd = jnp.zeros((n, n), jnp.int32)
    for k in range(1, k_step + 1):
        if k > 1:
            p = jnp.dot(p, adj, preferred_element_type=jnp.float32)     # MXU 16x16 matmuls
        newly = jnp.logical_and(jnp.logical_and(p > 0.0, spd == 0), off_diag)
        spd = jnp.where(newly, k, spd)                 # first k at which (i,j) is reachable
    spd_ref[0] = spd                                   # diagonal stays class 0


def pallas_spd(x, mask, k_step):
    B, _, N, _ = x.shape
    kern = functools.partial(_spd_kernel, n=N, k_step=k_step)
    return pl.pallas_call(
        kern,
        out_shape=jax.ShapeDtypeStruct((B, N, N), jnp.int32),
        grid=(B,),
        in_specs=[
            pl.BlockSpec((1, 1, N, N), lambda b: (b, 0, 0, 0)),
            pl.BlockSpec((1, 1, N, N), lambda b: (b, 0, 0, 0)),
        ],
        out_specs=pl.BlockSpec((1, N, N), lambda b: (b, 0, 0)),
        compiler_params=pltpu.CompilerParams(dimension_semantics=("parallel",)),
    )(x, mask)


# ------------------------- Pallas kernel 2: fused temb MLP + edge encoders + head -------------------------
def _edge_head_kernel(temb_ref, x_ref, spd_ref,
                      t0w_ref, t0b_ref, t1w_ref, t1b_ref, gtw_ref, gtb_ref,
                      wsT_ref, wx_ref, o1w_ref, o1b_ref, o2w_ref, o2b_ref,
                      o_ref, *, k_step):
    b = pl.program_id(0)

    # ---- timestep-embedding MLP (Linear -> SiLU -> Linear -> SiLU -> proj), column form ----
    t_all = temb_ref[...]                                                           # [nf, B]
    h = jnp.dot(t0w_ref[...], t_all, preferred_element_type=jnp.float32) + t0b_ref[...]
    h = silu(h)
    h = jnp.dot(t1w_ref[...], h, preferred_element_type=jnp.float32) + t1b_ref[...]
    h = silu(h)
    tproj = jnp.dot(gtw_ref[...], h, preferred_element_type=jnp.float32) + gtb_ref[...]  # [nf//2, B]
    lane = jax.lax.broadcasted_iota(jnp.int32, tproj.shape, 1)
    temb_col = jnp.sum(jnp.where(lane == b, tproj, 0.0), axis=1, keepdims=True)          # [nf//2, 1]

    # ---- per-edge features, lane-dense [C, N*N] layout (pixels on the 256 lanes) ----
    x_row = x_ref[0]                                     # [1, N*N]  raw edge values
    spd_row = spd_ref[0]                                 # [1, N*N]  int32 SPD classes
    nn = x_row.shape[1]
    cls = jax.lax.broadcasted_iota(jnp.int32, (k_step + 1, nn), 0)
    spd_oh = (cls == spd_row).astype(jnp.float32)        # [rw+1, N*N] one-hot

    # folded conv1x1(x) + conv1x1(spd) + edge-mix linear + temb bias (all affine, fused at trace time)
    h1 = (jnp.dot(wsT_ref[...], spd_oh, preferred_element_type=jnp.float32)
          + wx_ref[...] * x_row + temb_col)              # [nf//2, N*N]
    h1 = silu(h1)                                        # pos_gnn stand-in edge state (h_dense_edge)
    z = silu(h1)                                         # act() before the first output conv1x1
    h2 = silu(jnp.dot(o1w_ref[...], z, preferred_element_type=jnp.float32) + o1b_ref[...])
    out = jnp.dot(o2w_ref[...], h2, preferred_element_type=jnp.float32) + o2b_ref[...]   # [1, N*N]
    o_ref[0] = out                                       # full-width (256-lane) store


def pallas_edge_head(temb0T, x_flat, spd_flat, weights):
    NFdim, B = temb0T.shape
    _, _, NN = x_flat.shape
    kern = functools.partial(_edge_head_kernel, k_step=RW_DEPTH)
    w_specs = [pl.BlockSpec(w.shape, lambda b: (0, 0)) for w in weights]
    return pl.pallas_call(
        kern,
        out_shape=jax.ShapeDtypeStruct((B, 1, NN), jnp.float32),
        grid=(B,),
        in_specs=[pl.BlockSpec((NFdim, B), lambda b: (0, 0)),
                  pl.BlockSpec((1, 1, NN), lambda b: (b, 0, 0)),
                  pl.BlockSpec((1, 1, NN), lambda b: (b, 0, 0))] + w_specs,
        out_specs=pl.BlockSpec((1, 1, NN), lambda b: (b, 0, 0)),
        compiler_params=pltpu.CompilerParams(dimension_semantics=("parallel",)),
    )(temb0T, x_flat, spd_flat, *weights)


# ------------------------- Pallas kernel 3: symmetrize + mask -------------------------
def _sym_kernel(h_ref, m_ref, o_ref):
    h = h_ref[0, 0]
    o_ref[0, 0] = (h + h.T) * 0.5 * m_ref[0, 0]


def pallas_symmetrize(h, mask):
    B, C, N, _ = h.shape
    return pl.pallas_call(
        _sym_kernel,
        out_shape=jax.ShapeDtypeStruct((B, C, N, N), jnp.float32),
        grid=(B,),
        in_specs=[
            pl.BlockSpec((1, 1, N, N), lambda b: (b, 0, 0, 0)),
            pl.BlockSpec((1, 1, N, N), lambda b: (b, 0, 0, 0)),
        ],
        out_specs=pl.BlockSpec((1, 1, N, N), lambda b: (b, 0, 0, 0)),
        compiler_params=pltpu.CompilerParams(dimension_semantics=("parallel",)),
    )(h, mask)


# ------------------------- plain-JAX glue -------------------------
def get_timestep_embedding_T(timesteps, embedding_dim, max_positions=10000):
    """Sinusoidal timestep embedding, produced already transposed: [embedding_dim, B]."""
    half_dim = embedding_dim // 2
    emb = math.log(max_positions) / (half_dim - 1)
    freqs = jnp.exp(jnp.arange(half_dim, dtype=jnp.float32) * -emb)        # [half]
    ang = freqs[:, None] * timesteps.astype(jnp.float32)[None, :]          # [half, B]
    return jnp.concatenate([jnp.sin(ang), jnp.cos(ang)], axis=0)           # [dim, B]


def init_params(key):
    def dense(k, fan_in, fan_out):
        w = jax.random.normal(k, (fan_in, fan_out), jnp.float32) / math.sqrt(fan_in)
        return w, jnp.zeros((fan_out,), jnp.float32)

    ks = jax.random.split(key, 10)
    p = {}
    p["t_w0"], p["t_b0"] = dense(ks[0], NF, NF * 4)                 # Linear(nf, 4nf)
    p["t_w1"], p["t_b1"] = dense(ks[1], NF * 4, NF * 4)             # Linear(4nf, 4nf)
    p["convx_w"], p["convx_b"] = dense(ks[2], CHANNELS, NF // 2)    # conv1x1(1, nf//2)
    p["convspd_w"], p["convspd_b"] = dense(ks[3], RW_DEPTH + 1, NF // 2)  # conv1x1(rw+1, nf//2)
    p["deg_w"], p["deg_b"] = dense(ks[4], DEGREE_MAX + 1, NF)       # Linear(deg_max+1, x_ch)  (unused: pos_gnn stub)
    p["pos_w"], p["pos_b"] = dense(ks[5], RW_DEPTH, NF // 2)        # Linear(rw, pos_ch)       (unused: pos_gnn stub)
    p["g_w"], p["g_b"] = dense(ks[6], NF, NF // 2)                  # pos_gnn stand-in edge mix
    p["gt_w"], p["gt_b"] = dense(ks[7], NF * 4, NF // 2)            # pos_gnn temb projection
    p["o1_w"], p["o1_b"] = dense(ks[8], NF // 2, NF // 2)           # conv1x1(nf//2, nf//2)
    p["o2_w"], p["o2_b"] = dense(ks[9], NF // 2, CHANNELS)          # conv1x1(nf//2, 1)
    return p


@jax.jit
def pgsn_forward(params, x, time_cond, mask):
    B, C, N, _ = x.shape
    NN = N * N
    half = NF // 2

    # SIZE_COND is False -> no size conditioning branch.
    if not CENTERED:
        x = x * 2.0 - 1.0

    # timestep embedding, transposed ([nf, B]) for the column-form temb MLP in the fused kernel
    temb0T = get_timestep_embedding_T(time_cond, NF)

    # ---- trace-time weight folding: conv1x1(x), conv1x1(spd) and edge-mix g are all linear with
    #      no nonlinearity between them, so they collapse to one affine map (and the constant bias
    #      folds into the temb-projection bias). ----
    g_top = params["g_w"][:half]                                     # rows acting on conv1x1(x) feats
    g_bot = params["g_w"][half:]                                     # rows acting on conv1x1(spd) feats
    wx_col = (params["convx_w"] @ g_top).T                           # [nf//2, 1]
    ws_T = (params["convspd_w"] @ g_bot).T                           # [nf//2, rw+1]
    b_fold = params["convx_b"] @ g_top + params["convspd_b"] @ g_bot + params["g_b"]
    gtb_fold = (params["gt_b"] + b_fold).reshape(half, 1)            # [nf//2, 1]

    weights = (params["t_w0"].T, params["t_b0"].reshape(-1, 1),
               params["t_w1"].T, params["t_b1"].reshape(-1, 1),
               params["gt_w"].T, gtb_fold,
               ws_T, wx_col,
               params["o1_w"].T, params["o1_b"].reshape(-1, 1),
               params["o2_w"].T, params["o2_b"].reshape(1, 1))

    # TODO(synk): `gnns.pos_gnn` (external multi-layer graph transformer) source is unavailable;
    # it is replaced by a single temb-conditioned edge-mixing layer.  Its node-feature inputs
    # (cont_adj, degree one-hot Linear, random-walk landing-prob Linear, edge_index) are therefore
    # dead and are not computed.

    # Kernel 1: binarized adjacency -> per-edge SPD classes
    spd = pallas_spd(x, mask, RW_DEPTH)                              # [B, N, N] int32

    # Kernel 2: fused temb MLP + folded conv1x1 encoders + edge mixing + output head (lane-dense)
    x_flat = x.reshape(B, 1, NN)                                     # free (contiguous) reshapes
    spd_flat = spd.reshape(B, 1, NN)
    h = pallas_edge_head(temb0T, x_flat, spd_flat, weights)          # [B, 1, N*N]

    # Kernel 3: symmetrize over node axes and apply mask -> NCHW [B, 1, N, N]
    return pallas_symmetrize(h.reshape(B, C, N, N), mask)


if __name__ == "__main__":
    key = jax.random.PRNGKey(0)
    kp, kx, kt = jax.random.split(key, 3)
    params = init_params(kp)

    B, N = 2, MAX_NODE
    x = jax.random.normal(kx, (B, CHANNELS, N, N), jnp.float32)
    x = (x + jnp.transpose(x, (0, 1, 3, 2))) / 2.0                 # noisy symmetric adjacency
    time_cond = jax.random.uniform(kt, (B,), jnp.float32) * 999.0
    mask = jnp.broadcast_to((1.0 - jnp.eye(N, dtype=jnp.float32))[None, None],
                            (B, CHANNELS, N, N))

    out = pgsn_forward(params, x, time_cond, mask)
    jax.block_until_ready(out)
    assert out.shape == (B, CHANNELS, N, N)
    print("KERNEL_OK")
</pallas_src>

<mosaic_0001>
module attributes {stable_mosaic.version = 11 : i64} {
  func.func @_sym_kernel(%arg0: i32, %arg1: memref<1x1x16x16xf32, #tpu.memory_space<vmem>>, %arg2: memref<1x1x16x16xf32, #tpu.memory_space<vmem>>, %arg3: memref<1x1x16x16xf32, #tpu.memory_space<vmem>>) attributes {dimension_semantics = [#tpu.dimension_semantics<parallel>], iteration_bounds = array<i64: 2>, scalar_prefetch = 0 : i64, scratch_operands = 0 : i64, tpu.core_type = #tpu.core_type<tc>, window_params = [{transform_indices = @transform_0, window_bounds = array<i64: 1, 1, 16, 16>}, {transform_indices = @transform_1, window_bounds = array<i64: 1, 1, 16, 16>}, {transform_indices = @transform_2, window_bounds = array<i64: 1, 1, 16, 16>}]} {
    %c0 = arith.constant 0 : index
    %c0_0 = arith.constant 0 : index
    %c0_1 = arith.constant 0 : index
    %c0_2 = arith.constant 0 : index
    %0 = vector.load %arg1[%c0, %c0_0, %c0_1, %c0_2] : memref<1x1x16x16xf32, #tpu.memory_space<vmem>>, vector<1x1x16x16xf32>
    %1 = vector.shape_cast %0 : vector<1x1x16x16xf32> to vector<16x16xf32>
    %2 = tpu.transpose %1, [1, 0] : vector<16x16xf32> -> vector<16x16xf32>
    %3 = arith.addf %1, %2 : vector<16x16xf32>
    %cst = arith.constant 5.000000e-01 : f32
    %4 = vector.broadcast %cst : f32 to vector<16x16xf32>
    %5 = arith.mulf %3, %4 : vector<16x16xf32>
    %c0_3 = arith.constant 0 : index
    %c0_4 = arith.constant 0 : index
    %c0_5 = arith.constant 0 : index
    %c0_6 = arith.constant 0 : index
    %6 = vector.load %arg2[%c0_3, %c0_4, %c0_5, %c0_6] : memref<1x1x16x16xf32, #tpu.memory_space<vmem>>, vector<1x1x16x16xf32>
    %7 = vector.shape_cast %6 : vector<1x1x16x16xf32> to vector<16x16xf32>
    %8 = arith.mulf %5, %7 : vector<16x16xf32>
    %c0_7 = arith.constant 0 : index
    %c0_8 = arith.constant 0 : index
    %c0_9 = arith.constant 0 : index
    %c0_10 = arith.constant 0 : index
    %9 = vector.load %arg3[%c0_7, %c0_8, %c0_9, %c0_10] : memref<1x1x16x16xf32, #tpu.memory_space<vmem>>, vector<1x1x16x16xf32>
    %10 = vector.shape_cast %9 : vector<1x1x16x16xf32> to vector<16x16xf32>
    %11 = vector.shape_cast %8 : vector<16x16xf32> to vector<1x1x16x16xf32>
    tpu.vector_store %arg3[%c0_7, %c0_8, %c0_9, %c0_10], %11 {strides = array<i32>} : memref<1x1x16x16xf32, #tpu.memory_space<vmem>>, vector<1x1x16x16xf32>,
    return
  }
  func.func @transform_0(%arg0: i32) -> (i32, i32, i32, i32) {
    %c0_i32 = arith.constant 0 : i32
    %c0_i32_0 = arith.constant 0 : i32
    %c0_i32_1 = arith.constant 0 : i32
    %c0_i32_2 = arith.constant 0 : i32
    return %arg0, %c0_i32, %c0_i32_0, %c0_i32_1 : i32, i32, i32, i32
  }
  func.func @transform_1(%arg0: i32) -> (i32, i32, i32, i32) {
    %c0_i32 = arith.constant 0 : i32
    %c0_i32_0 = arith.constant 0 : i32
    %c0_i32_1 = arith.constant 0 : i32
    %c0_i32_2 = arith.constant 0 : i32
    return %arg0, %c0_i32, %c0_i32_0, %c0_i32_1 : i32, i32, i32, i32
  }
  func.func @transform_2(%arg0: i32) -> (i32, i32, i32, i32) {
    %c0_i32 = arith.constant 0 : i32
    %c0_i32_0 = arith.constant 0 : i32
    %c0_i32_1 = arith.constant 0 : i32
    %c0_i32_2 = arith.constant 0 : i32
    return %arg0, %c0_i32, %c0_i32_0, %c0_i32_1 : i32, i32, i32, i32
  }
}

module attributes {stable_mosaic.version = 11 : i64} {
  func.func @_spd_kernel(%arg0: i32, %arg1: memref<1x1x16x16xf32, #tpu.memory_space<vmem>>, %arg2: memref<1x1x16x16xf32, #tpu.memory_space<vmem>>, %arg3: memref<1x16x16xi32, #tpu.memory_space<vmem>>) attributes {dimension_semantics = [#tpu.dimension_semantics<parallel>], iteration_bounds = array<i64: 2>, scalar_prefetch = 0 : i64, scratch_operands = 0 : i64, tpu.core_type = #tpu.core_type<tc>, window_params = [{transform_indices = @transform_0, window_bounds = array<i64: 1, 1, 16, 16>}, {transform_indices = @transform_1, window_bounds = array<i64: 1, 1, 16, 16>}, {transform_indices = @transform_2, window_bounds = array<i64: 1, 16, 16>}]} {
    %c0 = arith.constant 0 : index
    %c0_0 = arith.constant 0 : index
    %c0_1 = arith.constant 0 : index
    %c0_2 = arith.constant 0 : index
    %0 = vector.load %arg1[%c0, %c0_0, %c0_1, %c0_2] : memref<1x1x16x16xf32, #tpu.memory_space<vmem>>, vector<1x1x16x16xf32>
    %1 = vector.shape_cast %0 : vector<1x1x16x16xf32> to vector<16x16xf32>
    %c0_3 = arith.constant 0 : index
    %c0_4 = arith.constant 0 : index
    %c0_5 = arith.constant 0 : index
    %c0_6 = arith.constant 0 : index
    %2 = vector.load %arg2[%c0_3, %c0_4, %c0_5, %c0_6] : memref<1x1x16x16xf32, #tpu.memory_space<vmem>>, vector<1x1x16x16xf32>
    %3 = vector.shape_cast %2 : vector<1x1x16x16xf32> to vector<16x16xf32>
    %cst = arith.constant 0.000000e+00 : f32
    %4 = vector.broadcast %cst : f32 to vector<16x16xf32>
    %5 = arith.cmpf oge, %1, %4 : vector<16x16xf32>
    %cst_7 = arith.constant 1.000000e+00 : f32
    %cst_8 = arith.constant 0.000000e+00 : f32
    %6 = vector.broadcast %cst_7 : f32 to vector<16x16xf32>
    %7 = vector.broadcast %cst_8 : f32 to vector<16x16xf32>
    %8 = arith.select %5, %6, %7 : vector<16x16xi1>, vector<16x16xf32>
    %9 = arith.mulf %8, %3 : vector<16x16xf32>
    %10 = tpu.iota {dimensions = array<i32: 0>} : vector<16x16xi32>
    %11 = tpu.iota {dimensions = array<i32: 1>} : vector<16x16xi32>
    %12 = arith.cmpi ne, %10, %11 : vector<16x16xi32>
    %c0_i32 = arith.constant 0 : i32
    %13 = vector.broadcast %c0_i32 : i32 to vector<16x16xi32>
    %cst_9 = arith.constant 0.000000e+00 : f32
    %14 = vector.broadcast %cst_9 : f32 to vector<16x16xf32>
    %15 = arith.cmpf ogt, %9, %14 : vector<16x16xf32>
    %c0_i32_10 = arith.constant 0 : i32
    %16 = vector.broadcast %c0_i32_10 : i32 to vector<16x16xi32>
    %17 = arith.cmpi eq, %13, %16 : vector<16x16xi32>
    %18 = arith.andi %15, %17 : vector<16x16xi1>
    %19 = arith.andi %18, %12 : vector<16x16xi1>
    %c1_i32 = arith.constant 1 : i32
    %20 = vector.broadcast %c1_i32 : i32 to vector<16x16xi32>
    %21 = arith.select %19, %20, %13 : vector<16x16xi1>, vector<16x16xi32>
    %cst_11 = arith.constant dense<0.000000e+00> : vector<16x16xf32>
    %22 = tpu.matmul %9, %9, %cst_11 {dimension_numbers = #tpu.dot_dimension_numbers<[1], [0], [0], [1], [0, 0, 1, 1], [], []>} : vector<16x16xf32>, vector<16x16xf32>, vector<16x16xf32> -> vector<16x16xf32>
    %cst_12 = arith.constant 0.000000e+00 : f32
    %23 = vector.broadcast %cst_12 : f32 to vector<16x16xf32>
    %24 = arith.cmpf ogt, %22, %23 : vector<16x16xf32>
    %c0_i32_13 = arith.constant 0 : i32
    %25 = vector.broadcast %c0_i32_13 : i32 to vector<16x16xi32>
    %26 = arith.cmpi eq, %21, %25 : vector<16x16xi32>
    %27 = arith.andi %24, %26 : vector<16x16xi1>
    %28 = arith.andi %27, %12 : vector<16x16xi1>
    %c2_i32 = arith.constant 2 : i32
    %29 = vector.broadcast %c2_i32 : i32 to vector<16x16xi32>
    %30 = arith.select %28, %29, %21 : vector<16x16xi1>, vector<16x16xi32>
    %cst_14 = arith.constant dense<0.000000e+00> : vector<16x16xf32>
    %31 = tpu.matmul %22, %9, %cst_14 {dimension_numbers = #tpu.dot_dimension_numbers<[1], [0], [0], [1], [0, 0, 1, 1], [], []>} : vector<16x16xf32>, vector<16x16xf32>, vector<16x16xf32> -> vector<16x16xf32>
    %cst_15 = arith.constant 0.000000e+00 : f32
    %32 = vector.broadcast %cst_15 : f32 to vector<16x16xf32>
    %33 = arith.cmpf ogt, %31, %32 : vector<16x16xf32>
    %c0_i32_16 = arith.constant 0 : i32
    %34 = vector.broadcast %c0_i32_16 : i32 to vector<16x16xi32>
    %35 = arith.cmpi eq, %30, %34 : vector<16x16xi32>
    %36 = arith.andi %33, %35 : vector<16x16xi1>
    %37 = arith.andi %36, %12 : vector<16x16xi1>
    %c3_i32 = arith.constant 3 : i32
    %38 = vector.broadcast %c3_i32 : i32 to vector<16x16xi32>
    %39 = arith.select %37, %38, %30 : vector<16x16xi1>, vector<16x16xi32>
    %cst_17 = arith.constant dense<0.000000e+00> : vector<16x16xf32>
    %40 = tpu.matmul %31, %9, %cst_17 {dimension_numbers = #tpu.dot_dimension_numbers<[1], [0], [0], [1], [0, 0, 1, 1], [], []>} : vector<16x16xf32>, vector<16x16xf32>, vector<16x16xf32> -> vector<16x16xf32>
    %cst_18 = arith.constant 0.000000e+00 : f32
    %41 = vector.broadcast %cst_18 : f32 to vector<16x16xf32>
    %42 = arith.cmpf ogt, %40, %41 : vector<16x16xf32>
    %c0_i32_19 = arith.constant 0 : i32
    %43 = vector.broadcast %c0_i32_19 : i32 to vector<16x16xi32>
    %44 = arith.cmpi eq, %39, %43 : vector<16x16xi32>
    %45 = arith.andi %42, %44 : vector<16x16xi1>
    %46 = arith.andi %45, %12 : vector<16x16xi1>
    %c4_i32 = arith.constant 4 : i32
    %47 = vector.broadcast %c4_i32 : i32 to vector<16x16xi32>
    %48 = arith.select %46, %47, %39 : vector<16x16xi1>, vector<16x16xi32>
    %c0_20 = arith.constant 0 : index
    %c0_21 = arith.constant 0 : index
    %c0_22 = arith.constant 0 : index
    %49 = vector.load %arg3[%c0_20, %c0_21, %c0_22] : memref<1x16x16xi32, #tpu.memory_space<vmem>>, vector<1x16x16xi32>
    %50 = vector.shape_cast %49 : vector<1x16x16xi32> to vector<16x16xi32>
    %51 = vector.shape_cast %48 : vector<16x16xi32> to vector<1x16x16xi32>
    tpu.vector_store %arg3[%c0_20, %c0_21, %c0_22], %51 {strides = array<i32>} : memref<1x16x16xi32, #tpu.memory_space<vmem>>, vector<1x16x16xi32>,
    return
  }
  func.func @transform_0(%arg0: i32) -> (i32, i32, i32, i32) {
    %c0_i32 = arith.constant 0 : i32
    %c0_i32_0 = arith.constant 0 : i32
    %c0_i32_1 = arith.constant 0 : i32
    %c0_i32_2 = arith.constant 0 : i32
    return %arg0, %c0_i32, %c0_i32_0, %c0_i32_1 : i32, i32, i32, i32
  }
  func.func @transform_1(%arg0: i32) -> (i32, i32, i32, i32) {
    %c0_i32 = arith.constant 0 : i32
    %c0_i32_0 = arith.constant 0 : i32
    %c0_i32_1 = arith.constant 0 : i32
    %c0_i32_2 = arith.constant 0 : i32
    return %arg0, %c0_i32, %c0_i32_0, %c0_i32_1 : i32, i32, i32, i32
  }
  func.func @transform_2(%arg0: i32) -> (i32, i32, i32) {
    %c0_i32 = arith.constant 0 : i32
    %c0_i32_0 = arith.constant 0 : i32
    %c0_i32_1 = arith.constant 0 : i32
    return %arg0, %c0_i32, %c0_i32_0 : i32, i32, i32
  }
}

module attributes {stable_mosaic.version = 11 : i64} {
  func.func @_edge_head_kernel(%arg0: i32, %arg1: memref<32x2xf32, #tpu.memory_space<vmem>>, %arg2: memref<1x1x256xf32, #tpu.memory_space<vmem>>, %arg3: memref<1x1x256xi32, #tpu.memory_space<vmem>>, %arg4: memref<128x32xf32, #tpu.memory_space<vmem>>, %arg5: memref<128x1xf32, #tpu.memory_space<vmem>>, %arg6: memref<128x128xf32, #tpu.memory_space<vmem>>, %arg7: memref<128x1xf32, #tpu.memory_space<vmem>>, %arg8: memref<16x128xf32, #tpu.memory_space<vmem>>, %arg9: memref<16x1xf32, #tpu.memory_space<vmem>>, %arg10: memref<16x5xf32, #tpu.memory_space<vmem>>, %arg11: memref<16x1xf32, #tpu.memory_space<vmem>>, %arg12: memref<16x16xf32, #tpu.memory_space<vmem>>, %arg13: memref<16x1xf32, #tpu.memory_space<vmem>>, %arg14: memref<1x16xf32, #tpu.memory_space<vmem>>, %arg15: memref<1x1xf32, #tpu.memory_space<vmem>>, %arg16: memref<1x1x256xf32, #tpu.memory_space<vmem>>) attributes {dimension_semantics = [#tpu.dimension_semantics<parallel>], iteration_bounds = array<i64: 2>, scalar_prefetch = 0 : i64, scratch_operands = 0 : i64, tpu.core_type = #tpu.core_type<tc>, window_params = [{pipeline_mode = #tpu.pipeline_mode<synchronous>, transform_indices = @transform_0, window_bounds = array<i64: 32, 2>}, {transform_indices = @transform_1, window_bounds = array<i64: 1, 1, 256>}, {transform_indices = @transform_2, window_bounds = array<i64: 1, 1, 256>}, {pipeline_mode = #tpu.pipeline_mode<synchronous>, transform_indices = @transform_3, window_bounds = array<i64: 128, 32>}, {pipeline_mode = #tpu.pipeline_mode<synchronous>, transform_indices = @transform_4, window_bounds = array<i64: 128, 1>}, {pipeline_mode = #tpu.pipeline_mode<synchronous>, transform_indices = @transform_5, window_bounds = array<i64: 128, 128>}, {pipeline_mode = #tpu.pipeline_mode<synchronous>, transform_indices = @transform_6, window_bounds = array<i64: 128, 1>}, {pipeline_mode = #tpu.pipeline_mode<synchronous>, transform_indices = @transform_7, window_bounds = array<i64: 16, 128>}, {pipeline_mode = #tpu.pipeline_mode<synchronous>, transform_indices = @transform_8, window_bounds = array<i64: 16, 1>}, {pipeline_mode = #tpu.pipeline_mode<synchronous>, transform_indices = @transform_9, window_bounds = array<i64: 16, 5>}, {pipeline_mode = #tpu.pipeline_mode<synchronous>, transform_indices = @transform_10, window_bounds = array<i64: 16, 1>}, {pipeline_mode = #tpu.pipeline_mode<synchronous>, transform_indices = @transform_11, window_bounds = array<i64: 16, 16>}, {pipeline_mode = #tpu.pipeline_mode<synchronous>, transform_indices = @transform_12, window_bounds = array<i64: 16, 1>}, {pipeline_mode = #tpu.pipeline_mode<synchronous>, transform_indices = @transform_13, window_bounds = array<i64: 1, 16>}, {pipeline_mode = #tpu.pipeline_mode<synchronous>, transform_indices = @transform_14, window_bounds = array<i64: 1, 1>}, {transform_indices = @transform_15, window_bounds = array<i64: 1, 1, 256>}]} {
    %c0 = arith.constant 0 : index
    %c0_0 = arith.constant 0 : index
    %0 = vector.load %arg1[%c0, %c0_0] : memref<32x2xf32, #tpu.memory_space<vmem>>, vector<32x2xf32>
    %c0_1 = arith.constant 0 : index
    %c0_2 = arith.constant 0 : index
    %1 = vector.load %arg4[%c0_1, %c0_2] : memref<128x32xf32, #tpu.memory_space<vmem>>, vector<128x32xf32>
    %cst = arith.constant dense<0.000000e+00> : vector<128x2xf32>
    %2 = tpu.matmul %1, %0, %cst {dimension_numbers = #tpu.dot_dimension_numbers<[1], [0], [0], [1], [0, 0, 1, 1], [], []>} : vector<128x32xf32>, vector<32x2xf32>, vector<128x2xf32> -> vector<128x2xf32>
    %c0_3 = arith.constant 0 : index
    %c0_4 = arith.constant 0 : index
    %3 = vector.load %arg5[%c0_3, %c0_4] : memref<128x1xf32, #tpu.memory_space<vmem>>, vector<128x1xf32>
    %4 = vector.broadcast %3 : vector<128x1xf32> to vector<128x2xf32>
    %5 = arith.addf %2, %4 : vector<128x2xf32>
    %6 = arith.negf %5 : vector<128x2xf32>
    %7 = math.exp %6 : vector<128x2xf32>
    %cst_5 = arith.constant 1.000000e+00 : f32
    %8 = vector.broadcast %cst_5 : f32 to vector<128x2xf32>
    %9 = arith.addf %8, %7 : vector<128x2xf32>
    %10 = arith.divf %8, %9 : vector<128x2xf32>
    %11 = arith.mulf %5, %10 : vector<128x2xf32>
    %c0_6 = arith.constant 0 : index
    %c0_7 = arith.constant 0 : index
    %12 = vector.load %arg6[%c0_6, %c0_7] : memref<128x128xf32, #tpu.memory_space<vmem>>, vector<128x128xf32>
    %cst_8 = arith.constant dense<0.000000e+00> : vector<128x2xf32>
    %13 = tpu.matmul %12, %11, %cst_8 {dimension_numbers = #tpu.dot_dimension_numbers<[1], [0], [0], [1], [0, 0, 1, 1], [], []>} : vector<128x128xf32>, vector<128x2xf32>, vector<128x2xf32> -> vector<128x2xf32>
    %c0_9 = arith.constant 0 : index
    %c0_10 = arith.constant 0 : index
    %14 = vector.load %arg7[%c0_9, %c0_10] : memref<128x1xf32, #tpu.memory_space<vmem>>, vector<128x1xf32>
    %15 = vector.broadcast %14 : vector<128x1xf32> to vector<128x2xf32>
    %16 = arith.addf %13, %15 : vector<128x2xf32>
    %17 = arith.negf %16 : vector<128x2xf32>
    %18 = math.exp %17 : vector<128x2xf32>
    %cst_11 = arith.constant 1.000000e+00 : f32
    %19 = vector.broadcast %cst_11 : f32 to vector<128x2xf32>
    %20 = arith.addf %19, %18 : vector<128x2xf32>
    %21 = arith.divf %19, %20 : vector<128x2xf32>
    %22 = arith.mulf %16, %21 : vector<128x2xf32>
    %c0_12 = arith.constant 0 : index
    %c0_13 = arith.constant 0 : index
    %23 = vector.load %arg8[%c0_12, %c0_13] : memref<16x128xf32, #tpu.memory_space<vmem>>, vector<16x128xf32>
    %cst_14 = arith.constant dense<0.000000e+00> : vector<16x2xf32>
    %24 = tpu.matmul %23, %22, %cst_14 {dimension_numbers = #tpu.dot_dimension_numbers<[1], [0], [0], [1], [0, 0, 1, 1], [], []>} : vector<16x128xf32>, vector<128x2xf32>, vector<16x2xf32> -> vector<16x2xf32>
    %c0_15 = arith.constant 0 : index
    %c0_16 = arith.constant 0 : index
    %25 = vector.load %arg9[%c0_15, %c0_16] : memref<16x1xf32, #tpu.memory_space<vmem>>, vector<16x1xf32>
    %26 = vector.broadcast %25 : vector<16x1xf32> to vector<16x2xf32>
    %27 = arith.addf %24, %26 : vector<16x2xf32>
    %28 = tpu.iota {dimensions = array<i32: 1>} : vector<16x2xi32>
    %29 = vector.broadcast %arg0 : i32 to vector<16x2xi32>
    %30 = arith.cmpi eq, %28, %29 : vector<16x2xi32>
    %cst_17 = arith.constant 0.000000e+00 : f32
    %31 = vector.broadcast %cst_17 : f32 to vector<16x2xf32>
    %32 = arith.select %30, %27, %31 : vector<16x2xi1>, vector<16x2xf32>
    %cst_18 = arith.constant dense<0.000000e+00> : vector<16xf32>
    %33 = vector.multi_reduction <add>, %32, %cst_18 [1] : vector<16x2xf32> to vector<16xf32>
    %34 = vector.shape_cast %33 : vector<16xf32> to vector<16x1xf32>
    %c0_19 = arith.constant 0 : index
    %c0_20 = arith.constant 0 : index
    %c0_21 = arith.constant 0 : index
    %35 = vector.load %arg2[%c0_19, %c0_20, %c0_21] : memref<1x1x256xf32, #tpu.memory_space<vmem>>, vector<1x1x256xf32>
    %36 = vector.shape_cast %35 : vector<1x1x256xf32> to vector<1x256xf32>
    %c0_22 = arith.constant 0 : index
    %c0_23 = arith.constant 0 : index
    %c0_24 = arith.constant 0 : index
    %37 = vector.load %arg3[%c0_22, %c0_23, %c0_24] : memref<1x1x256xi32, #tpu.memory_space<vmem>>, vector<1x1x256xi32>
    %38 = vector.shape_cast %37 : vector<1x1x256xi32> to vector<1x256xi32>
    %39 = tpu.iota {dimensions = array<i32: 0>} : vector<5x256xi32>
    %40 = vector.broadcast %38 : vector<1x256xi32> to vector<5x256xi32>
    %41 = arith.cmpi eq, %39, %40 : vector<5x256xi32>
    %42 = arith.extui %41 : vector<5x256xi1> to vector<5x256xi32>
    %43 = arith.sitofp %42 : vector<5x256xi32> to vector<5x256xf32>
    %c0_25 = arith.constant 0 : index
    %c0_26 = arith.constant 0 : index
    %44 = vector.load %arg10[%c0_25, %c0_26] : memref<16x5xf32, #tpu.memory_space<vmem>>, vector<16x5xf32>
    %cst_27 = arith.constant dense<0.000000e+00> : vector<16x256xf32>
    %45 = tpu.matmul %44, %43, %cst_27 {dimension_numbers = #tpu.dot_dimension_numbers<[1], [0], [0], [1], [0, 0, 1, 1], [], []>} : vector<16x5xf32>, vector<5x256xf32>, vector<16x256xf32> -> vector<16x256xf32>
    %c0_28 = arith.constant 0 : index
    %c0_29 = arith.constant 0 : index
    %46 = vector.load %arg11[%c0_28, %c0_29] : memref<16x1xf32, #tpu.memory_space<vmem>>, vector<16x1xf32>
    %47 = vector.broadcast %46 : vector<16x1xf32> to vector<16x256xf32>
    %48 = vector.broadcast %36 : vector<1x256xf32> to vector<16x256xf32>
    %49 = arith.mulf %47, %48 : vector<16x256xf32>
    %50 = arith.addf %45, %49 : vector<16x256xf32>
    %51 = vector.broadcast %34 : vector<16x1xf32> to vector<16x256xf32>
    %52 = arith.addf %50, %51 : vector<16x256xf32>
    %53 = arith.negf %52 : vector<16x256xf32>
    %54 = math.exp %53 : vector<16x256xf32>
    %cst_30 = arith.constant 1.000000e+00 : f32
    %55 = vector.broadcast %cst_30 : f32 to vector<16x256xf32>
    %56 = arith.addf %55, %54 : vector<16x256xf32>
    %57 = arith.divf %55, %56 : vector<16x256xf32>
    %58 = arith.mulf %52, %57 : vector<16x256xf32>
    %59 = arith.negf %58 : vector<16x256xf32>
    %60 = math.exp %59 : vector<16x256xf32>
    %cst_31 = arith.constant 1.000000e+00 : f32
    %61 = vector.broadcast %cst_31 : f32 to vector<16x256xf32>
    %62 = arith.addf %61, %60 : vector<16x256xf32>
    %63 = arith.divf %61, %62 : vector<16x256xf32>
    %64 = arith.mulf %58, %63 : vector<16x256xf32>
    %c0_32 = arith.constant 0 : index
    %c0_33 = arith.constant 0 : index
    %65 = vector.load %arg12[%c0_32, %c0_33] : memref<16x16xf32, #tpu.memory_space<vmem>>, vector<16x16xf32>
    %cst_34 = arith.constant dense<0.000000e+00> : vector<16x256xf32>
    %66 = tpu.matmul %65, %64, %cst_34 {dimension_numbers = #tpu.dot_dimension_numbers<[1], [0], [0], [1], [0, 0, 1, 1], [], []>} : vector<16x16xf32>, vector<16x256xf32>, vector<16x256xf32> -> vector<16x256xf32>
    %c0_35 = arith.constant 0 : index
    %c0_36 = arith.constant 0 : index
    %67 = vector.load %arg13[%c0_35, %c0_36] : memref<16x1xf32, #tpu.memory_space<vmem>>, vector<16x1xf32>
    %68 = vector.broadcast %67 : vector<16x1xf32> to vector<16x256xf32>
    %69 = arith.addf %66, %68 : vector<16x256xf32>
    %70 = arith.negf %69 : vector<16x256xf32>
    %71 = math.exp %70 : vector<16x256xf32>
    %cst_37 = arith.constant 1.000000e+00 : f32
    %72 = vector.broadcast %cst_37 : f32 to vector<16x256xf32>
    %73 = arith.addf %72, %71 : vector<16x256xf32>
    %74 = arith.divf %72, %73 : vector<16x256xf32>
    %75 = arith.mulf %69, %74 : vector<16x256xf32>
    %c0_38 = arith.constant 0 : index
    %c0_39 = arith.constant 0 : index
    %76 = vector.load %arg14[%c0_38, %c0_39] : memref<1x16xf32, #tpu.memory_space<vmem>>, vector<1x16xf32>
    %cst_40 = arith.constant dense<0.000000e+00> : vector<1x256xf32>
    %77 = tpu.matmul %76, %75, %cst_40 {dimension_numbers = #tpu.dot_dimension_numbers<[1], [0], [0], [1], [0, 0, 1, 1], [], []>} : vector<1x16xf32>, vector<16x256xf32>, vector<1x256xf32> -> vector<1x256xf32>
    %c0_41 = arith.constant 0 : index
    %c0_42 = arith.constant 0 : index
    %78 = vector.load %arg15[%c0_41, %c0_42] : memref<1x1xf32, #tpu.memory_space<vmem>>, vector<1x1xf32>
    %79 = vector.broadcast %78 : vector<1x1xf32> to vector<1x256xf32>
    %80 = arith.addf %77, %79 : vector<1x256xf32>
    %c0_43 = arith.constant 0 : index
    %c0_44 = arith.constant 0 : index
    %c0_45 = arith.constant 0 : index
    %81 = vector.load %arg16[%c0_43, %c0_44, %c0_45] : memref<1x1x256xf32, #tpu.memory_space<vmem>>, vector<1x1x256xf32>
    %82 = vector.shape_cast %81 : vector<1x1x256xf32> to vector<1x256xf32>
    %83 = vector.shape_cast %80 : vector<1x256xf32> to vector<1x1x256xf32>
    tpu.vector_store %arg16[%c0_43, %c0_44, %c0_45], %83 {strides = array<i32>} : memref<1x1x256xf32, #tpu.memory_space<vmem>>, vector<1x1x256xf32>,
    return
  }
  func.func @transform_0(%arg0: i32) -> (i32, i32) {
    %c0_i32 = arith.constant 0 : i32
    %c0_i32_0 = arith.constant 0 : i32
    %c0_i32_1 = arith.constant 0 : i32
    return %c0_i32, %c0_i32_0 : i32, i32
  }
  func.func @transform_1(%arg0: i32) -> (i32, i32, i32) {
    %c0_i32 = arith.constant 0 : i32
    %c0_i32_0 = arith.constant 0 : i32
    %c0_i32_1 = arith.constant 0 : i32
    return %arg0, %c0_i32, %c0_i32_0 : i32, i32, i32
  }
  func.func @transform_2(%arg0: i32) -> (i32, i32, i32) {
    %c0_i32 = arith.constant 0 : i32
    %c0_i32_0 = arith.constant 0 : i32
    %c0_i32_1 = arith.constant 0 : i32
    return %arg0, %c0_i32, %c0_i32_0 : i32, i32, i32
  }
  func.func @transform_3(%arg0: i32) -> (i32, i32) {
    %c0_i32 = arith.constant 0 : i32
    %c0_i32_0 = arith.constant 0 : i32
    %c0_i32_1 = arith.constant 0 : i32
    return %c0_i32, %c0_i32_0 : i32, i32
  }
  func.func @transform_4(%arg0: i32) -> (i32, i32) {
    %c0_i32 = arith.constant 0 : i32
    %c0_i32_0 = arith.constant 0 : i32
    %c0_i32_1 = arith.constant 0 : i32
    return %c0_i32, %c0_i32_0 : i32, i32
  }
  func.func @transform_5(%arg0: i32) -> (i32, i32) {
    %c0_i32 = arith.constant 0 : i32
    %c0_i32_0 = arith.constant 0 : i32
    %c0_i32_1 = arith.constant 0 : i32
    return %c0_i32, %c0_i32_0 : i32, i32
  }
  func.func @transform_6(%arg0: i32) -> (i32, i32) {
    %c0_i32 = arith.constant 0 : i32
    %c0_i32_0 = arith.constant 0 : i32
    %c0_i32_1 = arith.constant 0 : i32
    return %c0_i32, %c0_i32_0 : i32, i32
  }
  func.func @transform_7(%arg0: i32) -> (i32, i32) {
    %c0_i32 = arith.constant 0 : i32
    %c0_i32_0 = arith.constant 0 : i32
    %c0_i32_1 = arith.constant 0 : i32
    return %c0_i32, %c0_i32_0 : i32, i32
  }
  func.func @transform_8(%arg0: i32) -> (i32, i32) {
    %c0_i32 = arith.constant 0 : i32
    %c0_i32_0 = arith.constant 0 : i32
    %c0_i32_1 = arith.constant 0 : i32
    return %c0_i32, %c0_i32_0 : i32, i32
  }
  func.func @transform_9(%arg0: i32) -> (i32, i32) {
    %c0_i32 = arith.constant 0 : i32
    %c0_i32_0 = arith.constant 0 : i32
    %c0_i32_1 = arith.constant 0 : i32
    return %c0_i32, %c0_i32_0 : i32, i32
  }
  func.func @transform_10(%arg0: i32) -> (i32, i32) {
    %c0_i32 = arith.constant 0 : i32
    %c0_i32_0 = arith.constant 0 : i32
    %c0_i32_1 = arith.constant 0 : i32
    return %c0_i32, %c0_i32_0 : i32, i32
  }
  func.func @transform_11(%arg0: i32) -> (i32, i32) {
    %c0_i32 = arith.constant 0 : i32
    %c0_i32_0 = arith.constant 0 : i32
    %c0_i32_1 = arith.constant 0 : i32
    return %c0_i32, %c0_i32_0 : i32, i32
  }
  func.func @transform_12(%arg0: i32) -> (i32, i32) {
    %c0_i32 = arith.constant 0 : i32
    %c0_i32_0 = arith.constant 0 : i32
    %c0_i32_1 = arith.constant 0 : i32
    return %c0_i32, %c0_i32_0 : i32, i32
  }
  func.func @transform_13(%arg0: i32) -> (i32, i32) {
    %c0_i32 = arith.constant 0 : i32
    %c0_i32_0 = arith.constant 0 : i32
    %c0_i32_1 = arith.constant 0 : i32
    return %c0_i32, %c0_i32_0 : i32, i32
  }
  func.func @transform_14(%arg0: i32) -> (i32, i32) {
    %c0_i32 = arith.constant 0 : i32
    %c0_i32_0 = arith.constant 0 : i32
    %c0_i32_1 = arith.constant 0 : i32
    return %c0_i32, %c0_i32_0 : i32, i32
  }
  func.func @transform_15(%arg0: i32) -> (i32, i32, i32) {
    %c0_i32 = arith.constant 0 : i32
    %c0_i32_0 = arith.constant 0 : i32
    %c0_i32_1 = arith.constant 0 : i32
    return %arg0, %c0_i32, %c0_i32_0 : i32, i32, i32
  }
}

</mosaic_0001>

<bundles_post_ra>
// kernel: pgsn_forward.5
= control target key start
LH: loop header
LB: loop body
LE: loop exit
PB: predicated region body
PF: predicated region fallthrough
CT: control target
= control target key end

     0   :  { %7 = vsyncpa [#allocation3], 0  ;;  %s539_s0 = inlined_call_operand.vmem [shape: f32[2,1,16,16], index: 0, kind: input, shape index: {}]   ;;  %s540_s1 = inlined_call_operand.vmem [shape: f32[2,1,16,16], index: 1, kind: input, shape index: {}]   ;;  %s541_s2 = inlined_call_operand.hbm [shape: f32[2,1,16,16], index: 2, kind: output, shape index: {}]  }
   0x1   :  { %9 = vsyncpa [#allocation3 + $0x1], 0  ;;  %s434_s9 = smov 0   ;;  %s436_s10 = smov 0  }
   0x2   :  { %s438_s11 = smov 0   ;;  %s440_s12 = smov 0  }
   0x3 LB: > { %s455_s13 = sadd.s32 4294967295, %s414_s12   ;;  %s295_s14 = sadd.s32 4294967294, %s414_s12   ;;  %s414_s12 = sphi %s440_s12, %s547_s12   ;;  %s410_s11 = sphi %s438_s11, %s546_s11   ;;  %s406_s10 = sphi %s436_s10, %s545_s10   ;;  %s402_s9 = sphi %s434_s9, %s544_s9  }
   0x4   : > { %s459_s15 = sadd.s32 1, %s414_s12   ;;  %s74_s16 = sadd.s32 1, %s410_s11 }
   0x5   : > { %s71_s17 = ssub.s32 %s414_s12, %s459_s15  ;;  %p84_p0 = scmp.ne.s32.totalorder %s410_s11, %s406_s10 }
   0x6   : > { %p72_p1 = scmp.eq.s32.totalorder %s71_s17, 0  ;;  %p85_p2 = scmp.eq.s32.totalorder %s455_s13, 1 }
   0x7   : > { %p90_p3 = scmp.ne.s32.totalorder %s406_s10, %s402_s9  ;;  %p91_p4 = scmp.eq.s32.totalorder %s295_s14, 1 }
   0x8   : > { %s470_s18 = scalar_select %p72_p1, %s410_s11, %s74_s16  }
   0x9   : > { %p472_p5 = por %p85_p2, %p84_p0  ;;  %p476_p6 = por %p91_p4, %p90_p3 }
   0xa   : > { %p298_p7 = scmp.ge.s32.totalorder %s414_s12, 1  ;;  %p125_p8 = scmp.lt.s32.totalorder %s414_s12, 3 }
   0xc   : > { %p126_p9 = pnand %p298_p7, %p125_p8 }
   0xd   : > { %p152_p10 = scmp.lt.s32.totalorder (!%p126_p9), %s455_s13, 1  ;;  %s149_s26 = sand.u32 (!%p126_p9), 1, %s406_s10  }
   0xe   : > { %129 = sbr.rel (%p126_p9) target bundleno = 173 (0xad), region = 28  ;;  %s299_s30 = sshll.u32 (!%p126_p9), %s149_s26, 4 }
   0xf   : > { %s311_s3 = sshll.u32 (!%p126_p9), %s455_s13, 8  ;;  %s151_s4 = scalar_lea.vmem (!%p126_p9), [#allocation2], %s299_s30 }
  0x10   : > { %s221_s5 = sshll.u32 (!%p126_p9), %s151_s4, 4  ;;  %s495_s8 = scalar_lea.hbm (!%p126_p9), %s541_s2, %s311_s3  ;;  %s497_s5 = int_to_ptr.vmem [resolvable:$true] %s221_s5 }
  0x11   : > { %s499_s14 = scalar_lea.sflag (!%p126_p9), [#allocation3], %s149_s26  ;;  %s416_s16 = smov (!%p126_p9), [#allocation2]  }
  0x12   : > { %s358_s17 = sshll.u32 (!%p126_p9), %s416_s16, 4  ;;  %s359_s17 = int_to_ptr.vmem [resolvable:$false] %s358_s17 }
  0x13   : > { %s153_s21 = scalar_select %p152_p10, %s455_s13, 1  ;;  %vm204_vm0 = vcmask 130048  }
  0x14   : > { %s354_s13 = scalar_lea.vmem %s497_s5, 256  ;;  %p361_p0 = scmp.lt.s32.totalorder %s497_s5, %s359_s17 }
  0x15   : > { %s309_s22 = sshll.u32 %s153_s21, 4  ;;  %p355_p11 = scmp.ne.s32.totalorder %s497_s5, %s354_s13 }
  0x16   : > { %s156_s25 = scalar_lea.vmem %s539_s0, %s309_s22  ;;  %s161_s29 = scalar_lea.vmem %s540_s1, %s309_s22 }
  0x17   : > { %v162_v0 = vld [vmem:[%s156_s25] sm:$0xff]  ;;  %v163_v1 = vld [vmem:[%s156_s25 + $0x8] sm:$0xff]  ;;  %p356_p12 = pnand %p355_p11, %p472_p5  ;;  %s360_s21 = scalar_lea.vmem %s359_s17, 512 }
  0x18   : > { %164 = vxpose.xlu0.b32.start [1/2] (short) (narrow) %v162_v0, 16  ;;  %v200_v4 = vld [vmem:[%s161_s29] sm:$0xff]  ;;  %v201_v9 = vld [vmem:[%s161_s29 + $0x8] sm:$0xff]  ;;  %p362_p1 = scmp.lt.s32.totalorder %s360_s21, %s354_s13 }
  0x19   : > { %p357_p13 = pneg %p356_p12 }
  0x1a   : > { %p363_p2 = por %p362_p1, %p361_p0 }
  0x1c   : > { %165 = vxpose.xlu0.b32.end [2/2] (short) (narrow) %v163_v1, 16  ;;  %p364_p3 = pnand %p363_p2, %p357_p13 }
  0x94   : > { %v180_v2 = vpop.trf.xlu0 }
  0x95   : > { %v196_v3 = vadd.f32 %v180_v2, %v162_v0 }
  0x97   : > { %v198_v5 = vmul.f32 0.5, %v196_v3 }
  0x98   : > { %v181_v6 = vpop.trf.xlu0 }
  0x99   : > { %v202_v7 = vmul.f32 %v200_v4, %v198_v5  ;;  %v197_v8 = vadd.f32 %v181_v6, %v163_v1 }
  0x9b   : > { %205 = vst.msk [vmem:[%s151_s4] sm:$0xff] %vm204_vm0, %v202_v7  ;;  %v199_v10 = vmul.f32 0.5, %v197_v8 }
  0x9d   : > { %v203_v11 = vmul.f32 %v201_v9, %v199_v10 }
  0x9f   : > { %206 = vst.msk [vmem:[%s151_s4 + $0x8] sm:$0xff] %vm204_vm0, %v203_v11 }
  0xa0   : > { %367 = shalt.err (!%p364_p3)
}
  0xa1   : > { %s368_s22 = scalar_lea.hbm %s495_s8, 256  ;;  %s372_s25 = scalar_lea.hbm %s541_s2, 512 }
  0xa2   : > { %p369_p4 = scmp.ne.s32.totalorder %s495_s8, %s368_s22  ;;  %p373_p9 = scmp.lt.s32.totalorder %s495_s8, %s541_s2 }
  0xa3   : > { %p374_p10 = scmp.lt.s32.totalorder %s372_s25, %s368_s22 }
  0xa4   : > { %p370_p7 = pnand %p369_p4, %p472_p5 }
  0xa5   : > { %p375_p11 = por %p374_p10, %p373_p9 }
  0xa6   : > { %p371_p8 = pneg %p370_p7 }
  0xa8   : > { %p376_p12 = pnand %p375_p11, %p371_p8 }
  0xaa   : > { %379 = shalt.err (!%p376_p12)
}
  0xab   : > { %s417_s28 = smov 128   ;;  %s418_s29 = smov 8  }
  0xac   : > { %312 = dma.vmem_to_hbm [thread:$0]  (%p472_p5), %s497_s5, 256, %s495_s8, %s499_s14, %s417_s28, %s417_s28, %s418_s29  }
  0xad PF: > { %p318_p13 = scmp.ge.s32.totalorder %s414_s12, 2  ;;  %s236_s30 = sand.u32 1, %s402_s9  }
  0xae   : > { %s237_s3 = scalar_lea.sflag [#allocation3], %s236_s30 }
  0xaf   : > { %p315_p0 = pnand %p318_p13, %p476_p6 }
  0xb1   : > { %p316_p1 = pneg %p315_p0 }
  0xb3   : > { %397 = dma.done.wait (%p316_p1), %s237_s3, 256  }
  0xb4   : > { %399 = vsyncadd (%p316_p1), %s237_s3, 4294967040  ;;  %p12_p2 = scmp.ge.s32.totalorder %s459_s15, 4   ;;  %s544_s9 = smov %s406_s10 }
  0xb5   : > { %s545_s10 = smov %s410_s11  ;;  %s546_s11 = smov %s470_s18 }
  0xb6   : > { %s547_s12 = smov %s459_s15  ;;  %14 = sbr.rel (!%p12_p2) target bundleno = 3 (0x3), region = 66 }
  0xbb   :  { %242 = vsyncpa [#allocation3], 1 }
  0xbc   :  { %244 = vsyncpa [#allocation3 + $0x1], 1 }

// kernel: pgsn_forward.3
= control target key start
LH: loop header
LB: loop body
LE: loop exit
PB: predicated region body
PF: predicated region fallthrough
CT: control target
= control target key end

     0   :  { %s622_s9 = smov 0   ;;  %s663_s0 = inlined_call_operand.vmem [shape: f32[2,1,16,16], index: 0, kind: input, shape index: {}]   ;;  %s664_s1 = inlined_call_operand.vmem [shape: f32[2,1,16,16], index: 1, kind: input, shape index: {}]   ;;  %s665_s2 = inlined_call_operand.vmem [shape: s32[2,16,16], index: 2, kind: output, shape index: {}]  }
   0x1 LB: > { %s530_s10 = sadd.s32 4294967295, %s603_s9   ;;  %p534_p0 = scmp.ge.s32.totalorder %s603_s9, 1  ;;  %s603_s9 = sphi %s622_s9, %s12_s9  }
   0x2   : > { %p122_p1 = scmp.lt.s32.totalorder %s603_s9, 3 }
   0x4   : > { %p123_p2 = pnand %p534_p0, %p122_p1 }
   0x5   : > { %p149_p3 = scmp.lt.s32.totalorder (!%p123_p2), %s530_s10, 1 }
   0x6   : > { %126 = sbr.rel (%p123_p2) target bundleno = 615 (0x267), region = 28 }
   0xb   : > { %s667_s10 = smov (!%p149_p3, %s530_s10), 1  ;;  %v605_v4 = vmov 0.0   ;;  %vm187_vm2 = vcmask 130048   ;;  %v174_v9 = vlaneseq  ;;  %v606_v14 = vmov 0  }
   0xc   : > { %s630_s11 = sshll.u32 %s667_s10, 4 }
   0xd   : > { %s153_s14 = scalar_lea.vmem %s663_s0, %s630_s11  ;;  %s158_s17 = scalar_lea.vmem %s664_s1, %s630_s11  ;;  %v175_v10 = vshrl.u32 %v174_v9, 7  ;;  %v178_v12 = vand.u32 127, %v174_v9 }
   0xe   : > { %v165_v0 = vld [vmem:[%s153_s14 + $0x8] sm:$0xff]  ;;  %v164_v2 = vld [vmem:[%s153_s14] sm:$0xff]  ;;  %s163_s20 = scalar_lea.vmem %s665_s2, %s630_s11 }
   0xf   : > { %v167_v1 = vld [vmem:[%s158_s17 + $0x8] sm:$0xff]  ;;  %vm169_vm0 = vcmp.ge.f32.partialorder %v165_v0, 0.0  ;;  %v166_v3 = vld [vmem:[%s158_s17] sm:$0xff]  ;;  %vm168_vm1 = vcmp.ge.f32.partialorder %v164_v2, 0.0  ;;  %v176_v11 = vadd.s32 8, %v175_v10  ;;  %vm179_vm14 = vcmp.ne.s32.totalorder %v175_v10, %v178_v12 }
  0x10   : > { %v171_v5 = vsel %vm169_vm0, 1.0, %v605_v4  ;;  %v170_v6 = vsel %vm168_vm1, 1.0, %v605_v4 }
  0x11   : > { %v173_v7 = vmul.f32 %v171_v5, %v167_v1  ;;  %v172_v8 = vmul.f32 %v170_v6, %v166_v3  ;;  %vm180_vm3 = vcmp.ne.s32.totalorder %v176_v11, %v178_v12 }
  0x13   : > { %566 = vmatprep.subr.mxu0 %v173_v7  ;;  %570 = vmatprep.mubr.msk.f32.mxu0 %vm187_vm2, %v172_v8  ;;  %vm182_vm4 = vcmp.gt.f32.partialorder %v173_v7, 0.0  ;;  %vm181_vm15 = vcmp.gt.f32.partialorder %v172_v8, 0.0 }
  0x14   : > { %567 = vmatpush3.msra.mxu0 %v173_v7  ;;  %573 = vmatprep.subr.mxu1 %v173_v7  ;;  %vm184_vm5 = vmand %vm182_vm4, %vm180_vm3 }
  0x15   : > { %568 = vmatprep.subr.mxu0 %v172_v8  ;;  %574 = vmatpush3.msra.mxu1 %v173_v7  ;;  %vm544_vm6 = vmneg %vm184_vm5  ;;  %v186_v15 = vsel %vm184_vm5, 1, %v606_v14 }
  0x16   : > { %569 = vmatpush3.msra.mxu0 %v172_v8  ;;  %575 = vmatprep.subr.mxu1 %v172_v8  ;;  %vm183_vm0 = vmand %vm181_vm15, %vm179_vm14 }
  0x17   : > { %571 = vmatmul.mubr.msk.f32.vlgmr.msra.gmra.mxu0 %vm187_vm2, %v173_v7  ;;  %576 = vmatpush3.msra.mxu1 %v172_v8  ;;  %vm543_vm4 = vmneg %vm183_vm0  ;;  %v185_v21 = vsel %vm183_vm0, 1, %v606_v14 }
  0x18   : > { %580 = vmatprep.subr.mxu0 %v173_v7 }
  0x19   : > { %581 = vmatpush3.msra.mxu0 %v173_v7 }
  0x1a   : > { %582 = vmatprep.subr.mxu0 %v172_v8 }
  0x1b   : > { %583 = vmatpush3.msra.mxu0 %v172_v8 }
  0xd7   : > { %v572_v13 = vpop.f32.mrf.mxu0 }
  0xd8   : > { %vm270_vm7 = vcmp.gt.f32.partialorder %v572_v13, 0.0 }
  0xd9   : > { %vm274_vm8 = vmand %vm270_vm7, %vm544_vm6  ;;  %v260_v16 = vpop.f32.mrf.mxu0 }
  0xda   : > { %vm276_vm9 = vmand %vm274_vm8, %vm180_vm3  ;;  %577 = vmatprep.mubr.msk.f32.mxu1 %vm187_vm2, %v260_v16  ;;  %vm269_vm1 = vcmp.gt.f32.partialorder %v260_v16, 0.0 }
  0xdb   : > { %578 = vmatmul.mubr.msk.f32.vlgmr.msra.gmra.mxu1 %vm187_vm2, %v572_v13  ;;  %v278_v17 = vsel %vm276_vm9, 2, %v186_v15  ;;  %vm273_vm5 = vmand %vm269_vm1, %vm543_vm4 }
  0xdc   : > { %vm363_vm11 = vcmp.eq.s32.totalorder %v278_v17, 0  ;;  %vm275_vm6 = vmand %vm273_vm5, %vm179_vm14 }
  0xdd   : > { %v277_v22 = vsel %vm275_vm6, 2, %v185_v21 }
  0xde   : > { %vm362_vm8 = vcmp.eq.s32.totalorder %v277_v22, 0 }
 0x19b   : > { %v579_v18 = vpop.f32.mrf.mxu1 }
 0x19c   : > { %vm361_vm10 = vcmp.gt.f32.partialorder %v579_v18, 0.0 }
 0x19d   : > { %vm365_vm12 = vmand %vm361_vm10, %vm363_vm11  ;;  %v351_v19 = vpop.f32.mrf.mxu1 }
 0x19e   : > { %vm367_vm13 = vmand %vm365_vm12, %vm180_vm3  ;;  %584 = vmatprep.mubr.msk.f32.mxu0 %vm187_vm2, %v351_v19  ;;  %vm360_vm7 = vcmp.gt.f32.partialorder %v351_v19, 0.0 }
 0x19f   : > { %585 = vmatmul.mubr.msk.f32.vlgmr.msra.gmra.mxu0 %vm187_vm2, %v579_v18  ;;  %v369_v20 = vsel %vm367_vm13, 3, %v278_v17  ;;  %vm364_vm9 = vmand %vm360_vm7, %vm362_vm8 }
 0x1a0   : > { %vm366_vm10 = vmand %vm364_vm9, %vm179_vm14  ;;  %vm454_vm12 = vcmp.eq.s32.totalorder %v369_v20, 0 }
 0x1a1   : > { %v368_v24 = vsel %vm366_vm10, 3, %v277_v22 }
 0x1a2   : > { %vm453_vm0 = vcmp.eq.s32.totalorder %v368_v24, 0 }
 0x25f   : > { %v586_v23 = vpop.f32.mrf.mxu0 }
 0x260   : > { %vm452_vm11 = vcmp.gt.f32.partialorder %v586_v23, 0.0 }
 0x261   : > { %vm456_vm13 = vmand %vm452_vm11, %vm454_vm12  ;;  %v442_v25 = vpop.f32.mrf.mxu0 }
 0x262   : > { %vm458_vm15 = vmand %vm456_vm13, %vm180_vm3  ;;  %vm451_vm1 = vcmp.gt.f32.partialorder %v442_v25, 0.0 }
 0x263   : > { %v460_v26 = vsel %vm458_vm15, 4, %v369_v20  ;;  %vm455_vm4 = vmand %vm451_vm1, %vm453_vm0 }
 0x264   : > { %462 = vst.msk [vmem:[%s163_s20 + $0x8] sm:$0xff] %vm187_vm2, %v460_v26  ;;  %vm457_vm5 = vmand %vm455_vm4, %vm179_vm14 }
 0x265   : > { %v459_v27 = vsel %vm457_vm5, 4, %v368_v24 }
 0x266   : > { %461 = vst.msk [vmem:[%s163_s20] sm:$0xff] %vm187_vm2, %v459_v27 }
 0x267 PF: > { %s12_s9 = sadd.s32 1, %s603_s9  }
 0x268   : > { %p9_p4 = scmp.ge.s32.totalorder %s12_s9, 4  }
 0x26a   :  { %11 = sbr.rel (!%p9_p4) target bundleno = 1 (0x1), region = 61 }

// kernel: pgsn_forward.4
= control target key start
LH: loop header
LB: loop body
LE: loop exit
PB: predicated region body
PF: predicated region fallthrough
CT: control target
= control target key end

     0   :  { %s2454_s20 = smov 0   ;;  %s2912_s0 = inlined_call_operand.vmem [shape: f32[32,2], index: 0, kind: input, shape index: {}]   ;;  %s2913_s1 = inlined_call_operand.vmem [shape: f32[2,1,256], index: 1, kind: input, shape index: {}]   ;;  %s2914_s2 = inlined_call_operand.vmem [shape: s32[2,1,256], index: 2, kind: input, shape index: {}]   ;;  %s2915_s3 = inlined_call_operand.vmem [shape: f32[128,32], index: 3, kind: input, shape index: {}]   ;;  %s2916_s4 = inlined_call_operand.vmem [shape: f32[128,1], index: 4, kind: input, shape index: {}]   ;;  %s2917_s5 = inlined_call_operand.vmem [shape: f32[128,128], index: 5, kind: input, shape index: {}]   ;;  %s2918_s6 = inlined_call_operand.vmem [shape: f32[128,1], index: 6, kind: input, shape index: {}]   ;;  %s2919_s7 = inlined_call_operand.vmem [shape: f32[16,128], index: 7, kind: input, shape index: {}]   ;;  %s2920_s8 = inlined_call_operand.vmem [shape: f32[16,1], index: 8, kind: input, shape index: {}]   ;;  %s2921_s9 = inlined_call_operand.vmem [shape: f32[16,5], index: 9, kind: input, shape index: {}]   ;;  %s2922_s10 = inlined_call_operand.vmem [shape: f32[16,1], index: 10, kind: input, shape index: {}]   ;;  %s2923_s11 = inlined_call_operand.vmem [shape: f32[16,16], index: 11, kind: input, shape index: {}]   ;;  %s2924_s12 = inlined_call_operand.vmem [shape: f32[16,1], index: 12, kind: input, shape index: {}]   ;;  %s2925_s13 = inlined_call_operand.vmem [shape: f32[1,16], index: 13, kind: input, shape index: {}]   ;;  %s2926_s14 = inlined_call_operand.<no memory space> [shape: f32[1,1], index: 14, kind: input, shape index: {}]   ;;  %s2927_s15 = inlined_call_operand.vmem [shape: f32[2,1,256], index: 15, kind: output, shape index: {}]  }
   0x1   :  { %v20_v0 = vstv %s2926_s14 }
   0x2   :  { %21 = vst [vmem:[#allocation2] sm:$0x1] %v20_v0 }
   0x3 LB: > { %s2460_s21 = sadd.s32 4294967295, %s2366_s20   ;;  %p1903_p0 = scmp.ge.s32.totalorder %s2366_s20, 1  ;;  %s2366_s20 = sphi %s2454_s20, %s27_s20  }
   0x4   : > { %p447_p1 = scmp.lt.s32.totalorder %s2366_s20, 3 }
   0x6   : > { %p448_p2 = pnand %p1903_p0, %p447_p1 }
   0x7   : > { %p497_p3 = scmp.lt.s32.totalorder (!%p448_p2), %s2460_s21, 1 }
   0x8   : > { %451 = sbr.rel (%p448_p2) target bundleno = 1465 (0x5b9), region = 80 }
   0xd   : > { %v512_v1 = vld [vmem:[%s2912_s0 + $0x18] sm:$0xff]  ;;  %v511_v2 = vld [vmem:[%s2912_s0 + $0x10] sm:$0xff]  ;;  %vm625_vm0 = vcmask 261120   ;;  %v513_v3 = vld [vmem:[%s2915_s3] sm:$0xff]  ;;  %v2368_v4 = vmov 0   ;;  %s498_s14 = scalar_select %p497_p3, %s2460_s21, 1 }
   0xe   : > { %2048 = vmatprep.subr.mxu0 %v512_v1  ;;  %2182 = vset.pattern.permute.xlu0 %v2368_v4  ;;  %v510_v5 = vld [vmem:[%s2912_s0 + $0x8] sm:$0xff]  ;;  %v509_v6 = vld [vmem:[%s2912_s0] sm:$0xff]  ;;  %v544_v8 = vld [vmem:[%s2916_s4 + $0x78] sm:$0xff]  ;;  %vm1456_vm3 = vcmask 1044480   ;;  %vm1449_vm4 = vcmask 39936   ;;  %vm1395_vm6 = vcmask 15360  }
   0xf   : > { %2049 = vmatpush3.msra.mxu0 %v512_v1  ;;  %2056 = vmatprep.mubr.msk.f32.mxu0 %vm625_vm0, %v513_v3  ;;  %v514_v7 = vld [vmem:[%s2915_s3 + $0x8] sm:$0xff]  ;;  %v515_v9 = vld [vmem:[%s2915_s3 + $0x10] sm:$0xff]  ;;  %v541_v12 = vld [vmem:[%s2916_s4 + $0x60] sm:$0xff]  ;;  %s2827_s24 = sshll.u32 %s498_s14, 1  ;;  %vm1614_vm7 = vcmask 130048  }
  0x10   : > { %2050 = vmatprep.subr.mxu0 %v511_v2  ;;  %2183 = vset.pattern.permute.xlu1 %v2368_v4  ;;  %v542_v10 = vld [vmem:[%s2916_s4 + $0x68] sm:$0xff]  ;;  %v543_v11 = vld [vmem:[%s2916_s4 + $0x70] sm:$0xff]  ;;  %v516_v13 = vld [vmem:[%s2915_s3 + $0x18] sm:$0xff]  ;;  %s504_s27 = scalar_lea.vmem %s2914_s2, %s2827_s24  ;;  %s500_s30 = scalar_lea.vmem %s2913_s1, %s2827_s24 }
  0x11   : > { %2051 = vmatpush3.msra.mxu0 %v511_v2  ;;  %622 = vperm.xlu0 %2182, %v544_v8   ;;  %v517_v14 = vld [vmem:[%s2915_s3 + $0x20] sm:$0xff]  ;;  %v540_v15 = vld [vmem:[%s2916_s4 + $0x58] sm:$0xff]  ;;  %v539_v16 = vld [vmem:[%s2916_s4 + $0x50] sm:$0xff]  ;;  %s508_s25 = scalar_lea.vmem %s2927_s15, %s2827_s24 }
  0x12   : > { %2052 = vmatprep.subr.mxu0 %v510_v5  ;;  %612 = vperm.xlu1 %2183, %v542_v10   ;;  %v518_v17 = vld [vmem:[%s2915_s3 + $0x28] sm:$0xff]  ;;  %v519_v18 = vld [vmem:[%s2915_s3 + $0x30] sm:$0xff]  ;;  %v537_v20 = vld [vmem:[%s2916_s4 + $0x40] sm:$0xff] }
  0x13   : > { %2053 = vmatpush3.msra.mxu0 %v510_v5  ;;  %v538_v19 = vld [vmem:[%s2916_s4 + $0x48] sm:$0xff]  ;;  %v520_v21 = vld [vmem:[%s2915_s3 + $0x38] sm:$0xff]  ;;  %v521_v22 = vld [vmem:[%s2915_s3 + $0x40] sm:$0xff] }
  0x14   : > { %2054 = vmatprep.subr.mxu0 %v509_v6  ;;  %v536_v23 = vld [vmem:[%s2916_s4 + $0x38] sm:$0xff]  ;;  %v535_v24 = vld [vmem:[%s2916_s4 + $0x30] sm:$0xff]  ;;  %v522_v25 = vld [vmem:[%s2915_s3 + $0x48] sm:$0xff] }
  0x15   : > { %2055 = vmatpush3.msra.mxu0 %v509_v6  ;;  %617 = vperm.xlu0 %2182, %v543_v11   ;;  %v523_v26 = vld [vmem:[%s2915_s3 + $0x50] sm:$0xff]  ;;  %v534_v27 = vld [vmem:[%s2916_s4 + $0x28] sm:$0xff]  ;;  %v533_v28 = vld [vmem:[%s2916_s4 + $0x20] sm:$0xff] }
  0x16   : > { %2057 = vmatmul.mubr.msk.f32.vlgmr.msra.gmra.mxu0 %vm625_vm0, %v514_v7  ;;  %607 = vperm.xlu1 %2183, %v541_v12   ;;  %v524_v29 = vld [vmem:[%s2915_s3 + $0x58] sm:$0xff]  ;;  %v525_v30 = vld [vmem:[%s2915_s3 + $0x60] sm:$0xff]  ;;  %v531_v32 = vld [vmem:[%s2916_s4 + $0x10] sm:$0xff] }
  0x17   : > { %2059 = vmatprep.mubr.msk.f32.mxu0 %vm625_vm0, %v515_v9  ;;  %v532_v31 = vld [vmem:[%s2916_s4 + $0x18] sm:$0xff]  ;;  %v526_v33 = vld [vmem:[%s2915_s3 + $0x68] sm:$0xff]  ;;  %v527_v34 = vld [vmem:[%s2915_s3 + $0x70] sm:$0xff] }
  0x18   : > { %v530_v35 = vld [vmem:[%s2916_s4 + $0x8] sm:$0xff]  ;;  %v529_v36 = vld [vmem:[%s2916_s4] sm:$0xff]  ;;  %v528_v37 = vld [vmem:[%s2915_s3 + $0x78] sm:$0xff] }
  0x19   : > { %602 = vperm.xlu0 %2182, %v540_v15   ;;  %v962_v38 = vld [vmem:[%s2918_s6 + $0x78] sm:$0xff]  ;;  %v961_v39 = vld [vmem:[%s2918_s6 + $0x70] sm:$0xff]  ;;  %v960_v40 = vld [vmem:[%s2918_s6 + $0x68] sm:$0xff] }
  0x1a   : > { %2060 = vmatmul.mubr.msk.f32.gmra.mxu0 %vm625_vm0, %v516_v13  ;;  %597 = vperm.xlu1 %2183, %v539_v16   ;;  %v959_v41 = vld [vmem:[%s2918_s6 + $0x60] sm:$0xff]  ;;  %v958_v42 = vld [vmem:[%s2918_s6 + $0x58] sm:$0xff]  ;;  %v957_v43 = vld [vmem:[%s2918_s6 + $0x50] sm:$0xff] }
  0x1b   : > { %2062 = vmatprep.mubr.msk.f32.mxu0 %vm625_vm0, %v517_v14  ;;  %v956_v44 = vld [vmem:[%s2918_s6 + $0x48] sm:$0xff]  ;;  %v955_v45 = vld [vmem:[%s2918_s6 + $0x40] sm:$0xff]  ;;  %v954_v46 = vld [vmem:[%s2918_s6 + $0x38] sm:$0xff] }
  0x1c   : > { %v953_v47 = vld [vmem:[%s2918_s6 + $0x30] sm:$0xff]  ;;  %v952_v48 = vld [vmem:[%s2918_s6 + $0x28] sm:$0xff]  ;;  %v951_v49 = vld [vmem:[%s2918_s6 + $0x20] sm:$0xff] }
  0x1d   : > { %592 = vperm.xlu0 %2182, %v538_v19   ;;  %v950_v50 = vld [vmem:[%s2918_s6 + $0x18] sm:$0xff]  ;;  %v949_v51 = vld [vmem:[%s2918_s6 + $0x10] sm:$0xff]  ;;  %v948_v52 = vld [vmem:[%s2918_s6 + $0x8] sm:$0xff] }
  0x1e   : > { %2063 = vmatmul.mubr.msk.f32.gmra.mxu0 %vm625_vm0, %v518_v17  ;;  %587 = vperm.xlu1 %2183, %v537_v20   ;;  %v947_v53 = vld [vmem:[%s2918_s6] sm:$0xff]  ;;  %v1303_v54 = vld [vmem:[%s2920_s8 + $0x8] sm:$0xff] }
  0x1f   : > { %2065 = vmatprep.mubr.msk.f32.mxu0 %vm625_vm0, %v519_v18  ;;  %v1302_v55 = vld [vmem:[%s2920_s8] sm:$0xff] }
  0x20   : > { %v931_v56 = vld [vmem:[%s2917_s5] sm:$0xff] }
  0x21   : > { %582 = vperm.xlu0 %2182, %v536_v23   ;;  %2112 = vmatprep.mubr.f32.mxu1 %v931_v56 }
  0x22   : > { %2066 = vmatmul.mubr.msk.f32.gmra.mxu0 %vm625_vm0, %v520_v21  ;;  %577 = vperm.xlu1 %2183, %v535_v24  }
  0x23   : > { %2068 = vmatprep.mubr.msk.f32.mxu0 %vm625_vm0, %v521_v22 }
  0x25   : > { %572 = vperm.xlu0 %2182, %v534_v27  }
  0x26   : > { %2069 = vmatmul.mubr.msk.f32.gmra.mxu0 %vm625_vm0, %v522_v25  ;;  %567 = vperm.xlu1 %2183, %v533_v28  }
  0x27   : > { %2071 = vmatprep.mubr.msk.f32.mxu0 %vm625_vm0, %v523_v26 }
  0x29   : > { %562 = vperm.xlu0 %2182, %v532_v31  }
  0x2a   : > { %2072 = vmatmul.mubr.msk.f32.gmra.mxu0 %vm625_vm0, %v524_v29  ;;  %557 = vperm.xlu1 %2183, %v531_v32  }
  0x2b   : > { %2074 = vmatprep.mubr.msk.f32.mxu0 %vm625_vm0, %v525_v30 }
  0x2d   : > { %552 = vperm.xlu0 %2182, %v530_v35  }
  0x2e   : > { %2075 = vmatmul.mubr.msk.f32.gmra.mxu0 %vm625_vm0, %v526_v33  ;;  %547 = vperm.xlu1 %2183, %v529_v36  }
  0x2f   : > { %2077 = vmatprep.mubr.msk.f32.mxu0 %vm625_vm0, %v527_v34 }
  0x31   : > { %1040 = vperm.xlu0 %2182, %v962_v38  }
  0x32   : > { %2078 = vmatmul.mubr.msk.f32.gmra.mxu0 %vm625_vm0, %v528_v37  ;;  %1035 = vperm.xlu1 %2183, %v961_v39  }
  0x35   : > { %1030 = vperm.xlu0 %2182, %v960_v40  }
  0x36   : > { %1025 = vperm.xlu1 %2183, %v959_v41  }
  0x39   : > { %1020 = vperm.xlu0 %2182, %v958_v42  }
  0x3a   : > { %1015 = vperm.xlu1 %2183, %v957_v43  }
  0x3d   : > { %1010 = vperm.xlu0 %2182, %v956_v44  }
  0x3e   : > { %1005 = vperm.xlu1 %2183, %v955_v45  }
  0x41   : > { %1000 = vperm.xlu0 %2182, %v954_v46  }
  0x42   : > { %995 = vperm.xlu1 %2183, %v953_v47  }
  0x45   : > { %990 = vperm.xlu0 %2182, %v952_v48  }
  0x46   : > { %985 = vperm.xlu1 %2183, %v951_v49  }
  0x49   : > { %980 = vperm.xlu0 %2182, %v950_v50  }
  0x4a   : > { %975 = vperm.xlu1 %2183, %v949_v51  }
  0x4d   : > { %970 = vperm.xlu0 %2182, %v948_v52  }
  0x4e   : > { %965 = vperm.xlu1 %2183, %v947_v53  }
  0x51   : > { %1311 = vperm.xlu0 %2182, %v1303_v54  }
  0x52   : > { %1306 = vperm.xlu1 %2183, %v1302_v55  }
  0x8c   : > { %v623_v58 = vpop.permute.xlu0 %622 }
  0x8d   : > { %v613_v61 = vpop.permute.xlu1 %612 }
  0x90   : > { %v618_v63 = vpop.permute.xlu0 %617 }
  0x91   : > { %v608_v2 = vpop.permute.xlu1 %607 }
  0x94   : > { %v603_v4 = vpop.permute.xlu0 %602 }
  0x95   : > { %v598_v7 = vpop.permute.xlu1 %597 }
  0x98   : > { %v593_v9 = vpop.permute.xlu0 %592 }
  0x99   : > { %v588_v12 = vpop.permute.xlu1 %587 }
  0x9c   : > { %v583_v15 = vpop.permute.xlu0 %582 }
  0x9d   : > { %v578_v23 = vpop.permute.xlu1 %577 }
  0xa0   : > { %v573_v29 = vpop.permute.xlu0 %572 }
  0xa1   : > { %v568_v34 = vpop.permute.xlu1 %567 }
  0xa4   : > { %v563_v37 = vpop.permute.xlu0 %562 }
  0xa5   : > { %v558_v44 = vpop.permute.xlu1 %557 }
  0xa8   : > { %v553_v52 = vpop.permute.xlu0 %552 }
  0xd6   : > { %v2645_v57 = vpop.f32.mrf.mxu0 }
  0xd7   : > { %v2691_v54 = vadd.f32 %v2645_v57, %v553_v52 }
  0xd8   : > { %v2647_v59 = vpop.f32.mrf.mxu0 }
  0xd9   : > { %v1924_v57 = vmul.f32 -1.442695, %v2691_v54 }
  0xda   : > { %v2061_v60 = vpop.f32.mrf.mxu0 }
  0xdb   : > { %v2677_v40 = vadd.f32 %v2061_v60, %v563_v37 }
  0xdc   : > { %v750_v62 = vpop.f32.mrf.mxu0 }
  0xdd   : > { %v1926_v46 = vmul.f32 -1.442695, %v2677_v40  ;;  %v2687_v49 = vadd.f32 %v750_v62, %v558_v44 }
  0xde   : > { %v2064_v0 = vpop.f32.mrf.mxu0 }
  0xdf   : > { %v2679_v41 = vadd.f32 %v2064_v0, %v573_v29  ;;  %v1925_v62 = vmul.f32 -1.442695, %v2687_v49 }
  0xe0   : > { %v760_v1 = vpop.f32.mrf.mxu0 }
  0xe1   : > { %v2682_v43 = vadd.f32 %v760_v1, %v568_v34  ;;  %v1928_v48 = vmul.f32 -1.442695, %v2679_v41 }
  0xe2   : > { %v2067_v3 = vpop.f32.mrf.mxu0 }
  0xe3   : > { %v2671_v35 = vadd.f32 %v2067_v3, %v583_v15  ;;  %v1927_v50 = vmul.f32 -1.442695, %v2682_v43 }
  0xe4   : > { %v770_v5 = vpop.f32.mrf.mxu0 }
  0xe5   : > { %v2674_v38 = vadd.f32 %v770_v5, %v578_v23  ;;  %v1930_v42 = vmul.f32 -1.442695, %v2671_v35 }
  0xe6   : > { %v2070_v6 = vpop.f32.mrf.mxu0 }
  0xe7   : > { %v2665_v30 = vadd.f32 %v2070_v6, %v593_v9  ;;  %v1929_v45 = vmul.f32 -1.442695, %v2674_v38 }
  0xe8   : > { %v780_v8 = vpop.f32.mrf.mxu0 }
  0xe9   : > { %v2668_v32 = vadd.f32 %v780_v8, %v588_v12  ;;  %v1932_v36 = vmul.f32 -1.442695, %v2665_v30 }
  0xea   : > { %v2073_v10 = vpop.f32.mrf.mxu0 }
  0xeb   : > { %v2651_v17 = vadd.f32 %v2073_v10, %v603_v4  ;;  %v1931_v39 = vmul.f32 -1.442695, %v2668_v32 }
  0xec   : > { %v790_v11 = vpop.f32.mrf.mxu0 }
  0xed   : > { %v2659_v24 = vadd.f32 %v790_v11, %v598_v7  ;;  %v1934_v26 = vmul.f32 -1.442695, %v2651_v17 }
  0xee   : > { %v2076_v13 = vpop.f32.mrf.mxu0 }
  0xef   : > { %v2649_v14 = vadd.f32 %v2076_v13, %v613_v61  ;;  %v1933_v33 = vmul.f32 -1.442695, %v2659_v24 }
  0xf0   : > { %v800_v16 = vpop.f32.mrf.mxu0 }
  0xf1   : > { %v1936_v18 = vmul.f32 -1.442695, %v2649_v14  ;;  %v2654_v19 = vadd.f32 %v800_v16, %v608_v2 }
  0xf2   : > { %v2079_v20 = vpop.f32.mrf.mxu0 }
  0xf3   : > { %v1935_v21 = vmul.f32 -1.442695, %v2654_v19  ;;  %v2657_v22 = vadd.f32 %v2079_v20, %v623_v58  ;;  %2184 = vpow2.f32 %v1936_v18  ;;  %v548_v58 = vpop.permute.xlu1 %547 }
  0xf4   : > { %v810_v25 = vpop.f32.mrf.mxu0 }
  0xf5   : > { %v1938_v27 = vmul.f32 -1.442695, %v2657_v22  ;;  %v2663_v28 = vadd.f32 %v810_v25, %v618_v63  ;;  %2186 = vpow2.f32 %v1935_v21  ;;  %v2694_v63 = vadd.f32 %v2647_v59, %v548_v58 }
  0xf7   : > { %v1937_v31 = vmul.f32 -1.442695, %v2663_v28  ;;  %2188 = vpow2.f32 %v1938_v27  ;;  %v1923_v5 = vmul.f32 -1.442695, %v2694_v63 }
  0xf8   : > { %2190 = vpow2.f32 %v1934_v26 }
  0xf9   : > { %2192 = vpow2.f32 %v1937_v31 }
  0xfa   : > { %2194 = vpow2.f32 %v1933_v33 }
  0xfb   : > { %2196 = vpow2.f32 %v1932_v36 }
  0xfc   : > { %2198 = vpow2.f32 %v1931_v39 }
  0xfd   : > { %2200 = vpow2.f32 %v1930_v42 }
  0xfe   : > { %2202 = vpow2.f32 %v1929_v45 }
  0xff   : > { %2204 = vpow2.f32 %v1926_v46 }
 0x100   : > { %v2185_v47 = vpop.eup %2184  ;;  %2206 = vpow2.f32 %v1928_v48 }
 0x101   : > { %v880_v55 = vadd.f32 1.0, %v2185_v47  ;;  %2208 = vpow2.f32 %v1927_v50 }
 0x102   : > { %v2187_v51 = vpop.eup %2186 }
 0x103   : > { %v879_v0 = vadd.f32 1.0, %v2187_v51 }
 0x104   : > { %v2189_v53 = vpop.eup %2188 }
 0x105   : > { %v2191_v56 = vpop.eup %2190  ;;  %v882_v60 = vadd.f32 1.0, %v2189_v53 }
 0x106   : > { %v2193_v61 = vpop.eup %2192  ;;  %v878_v3 = vadd.f32 1.0, %v2191_v56 }
 0x107   : > { %2210 = vrcp.f32 %v882_v60  ;;  %v881_v1 = vadd.f32 1.0, %v2193_v61  ;;  %v2195_v2 = vpop.eup %2194 }
 0x108   : > { %2212 = vrcp.f32 %v880_v55  ;;  %v2197_v4 = vpop.eup %2196  ;;  %v877_v6 = vadd.f32 1.0, %v2195_v2  ;;  %v939_v2 = vld [vmem:[%s2917_s5 + $0x40] sm:$0xff] }
 0x109   : > { %2214 = vrcp.f32 %v881_v1  ;;  %v2199_v59 = vpop.eup %2198  ;;  %v876_v7 = vadd.f32 1.0, %v2197_v4  ;;  %v938_v1 = vld [vmem:[%s2917_s5 + $0x38] sm:$0xff] }
 0x10a   : > { %2216 = vpow2.f32 %v1925_v62  ;;  %v2201_v8 = vpop.eup %2200  ;;  %v875_v9 = vadd.f32 1.0, %v2199_v59  ;;  %v942_v4 = vld [vmem:[%s2917_s5 + $0x58] sm:$0xff]  ;;  %v945_v59 = vld [vmem:[%s2917_s5 + $0x70] sm:$0xff] }
 0x10b   : > { %2218 = vrcp.f32 %v879_v0  ;;  %v2203_v10 = vpop.eup %2202  ;;  %v874_v12 = vadd.f32 1.0, %v2201_v8  ;;  %v937_v0 = vld [vmem:[%s2917_s5 + $0x30] sm:$0xff]  ;;  %v1300_v8 = vld [vmem:[%s2919_s7] sm:$0xff] }
 0x10c   : > { %2220 = vpow2.f32 %v1924_v57  ;;  %v2205_v11 = vpop.eup %2204  ;;  %v873_v16 = vadd.f32 1.0, %v2203_v10  ;;  %v940_v57 = vld [vmem:[%s2917_s5 + $0x48] sm:$0xff]  ;;  %2168 = vmatprep.mubr.f32.mxu0 %v1300_v8  ;;  %v1041_v10 = vpop.permute.xlu0 %1040 }
 0x10d   : > { %2222 = vrcp.f32 %v878_v3  ;;  %v2207_v13 = vpop.eup %2206  ;;  %v870_v34 = vadd.f32 1.0, %v2205_v11  ;;  %v941_v3 = vld [vmem:[%s2917_s5 + $0x50] sm:$0xff] }
 0x10e   : > { %2224 = vpow2.f32 %v1923_v5  ;;  %v2209_v15 = vpop.eup %2208  ;;  %v872_v21 = vadd.f32 1.0, %v2207_v13  ;;  %v943_v5 = vld [vmem:[%s2917_s5 + $0x60] sm:$0xff]  ;;  %v1036_v13 = vpop.permute.xlu1 %1035 }
 0x10f   : > { %2226 = vrcp.f32 %v877_v6  ;;  %v871_v27 = vadd.f32 1.0, %v2209_v15  ;;  %v944_v6 = vld [vmem:[%s2917_s5 + $0x68] sm:$0xff] }
 0x110   : > { %2228 = vrcp.f32 %v876_v7  ;;  %v946_v7 = vld [vmem:[%s2917_s5 + $0x78] sm:$0xff] }
 0x111   : > { %2230 = vrcp.f32 %v875_v9 }
 0x112   : > { %2232 = vrcp.f32 %v874_v12 }
 0x113   : > { %2234 = vrcp.f32 %v873_v16  ;;  %v1031_v16 = vpop.permute.xlu0 %1030 }
 0x114   : > { %v2211_v18 = vpop.eup %2210  ;;  %2236 = vrcp.f32 %v872_v21  ;;  %v1026_v21 = vpop.permute.xlu1 %1025 }
 0x115   : > { %v2213_v20 = vpop.eup %2212  ;;  %v930_v23 = vmul.f32 %v2211_v18, %v2657_v22  ;;  %2238 = vrcp.f32 %v871_v27 }
 0x116   : > { %v2215_v25 = vpop.eup %2214  ;;  %v928_v36 = vmul.f32 %v2213_v20, %v2649_v14  ;;  %2240 = vrcp.f32 %v870_v34 }
 0x117   : > { %v2217_v26 = vpop.eup %2216  ;;  %v929_v29 = vmul.f32 %v2215_v25, %v2663_v28  ;;  %2080 = vmatprep.subr.mxu1 %v930_v23  ;;  %v1021_v25 = vpop.permute.xlu0 %1020 }
 0x118   : > { %v2219_v31 = vpop.eup %2218  ;;  %2081 = vmatpush3.msra.mxu1 %v930_v23  ;;  %v869_v42 = vadd.f32 1.0, %v2217_v26 }
 0x119   : > { %v2221_v33 = vpop.eup %2220  ;;  %2082 = vmatprep.subr.mxu1 %v929_v29  ;;  %v927_v22 = vmul.f32 %v2219_v31, %v2654_v19 }
 0x11a   : > { %v2223_v37 = vpop.eup %2222  ;;  %2083 = vmatpush3.msra.mxu1 %v929_v29  ;;  %v868_v28 = vadd.f32 1.0, %v2221_v33  ;;  %2242 = vrcp.f32 %v869_v42  ;;  %v1016_v29 = vpop.permute.xlu1 %1015 }
 0x11b   : > { %v2225_v39 = vpop.eup %2224  ;;  %2084 = vmatprep.subr.mxu1 %v928_v36  ;;  %v926_v45 = vmul.f32 %v2223_v37, %v2651_v17  ;;  %v1011_v33 = vpop.permute.xlu0 %1010 }
 0x11c   : > { %v2227_v44 = vpop.eup %2226  ;;  %2085 = vmatpush3.msra.mxu1 %v928_v36  ;;  %v867_v47 = vadd.f32 1.0, %v2225_v39  ;;  %2244 = vrcp.f32 %v868_v28 }
 0x11d   : > { %2086 = vmatprep.subr.mxu1 %v927_v22  ;;  %v2229_v46 = vpop.eup %2228  ;;  %v925_v14 = vmul.f32 %v2227_v44, %v2659_v24 }
 0x11e   : > { %2087 = vmatpush3.msra.mxu1 %v927_v22  ;;  %v2231_v48 = vpop.eup %2230  ;;  %v924_v19 = vmul.f32 %v2229_v46, %v2665_v30  ;;  %2246 = vrcp.f32 %v867_v47  ;;  %v1006_v37 = vpop.permute.xlu1 %1005 }
 0x11f   : > { %2088 = vmatprep.subr.mxu1 %v926_v45  ;;  %v2233_v50 = vpop.eup %2232  ;;  %v923_v51 = vmul.f32 %v2231_v48, %v2668_v32  ;;  %v1001_v22 = vpop.permute.xlu0 %1000 }
 0x120   : > { %2089 = vmatpush3.msra.mxu1 %v926_v45  ;;  %v2235_v17 = vpop.eup %2234  ;;  %v922_v52 = vmul.f32 %v2233_v50, %v2671_v35 }
 0x121   : > { %2090 = vmatprep.subr.mxu1 %v925_v14  ;;  %v2237_v53 = vpop.eup %2236  ;;  %v921_v24 = vmul.f32 %v2235_v17, %v2674_v38 }
 0x122   : > { %2091 = vmatpush3.msra.mxu1 %v925_v14  ;;  %v2239_v55 = vpop.eup %2238  ;;  %v920_v30 = vmul.f32 %v2237_v53, %v2679_v41 }
 0x123   : > { %2092 = vmatprep.subr.mxu1 %v924_v19  ;;  %v2241_v56 = vpop.eup %2240  ;;  %v919_v32 = vmul.f32 %v2239_v55, %v2682_v43  ;;  %v933_v43 = vld [vmem:[%s2917_s5 + $0x10] sm:$0xff] }
 0x124   : > { %2093 = vmatpush3.msra.mxu1 %v924_v19  ;;  %v918_v35 = vmul.f32 %v2241_v56, %v2677_v40  ;;  %v932_v40 = vld [vmem:[%s2917_s5 + $0x8] sm:$0xff]  ;;  %v996_v19 = vpop.permute.xlu1 %995 }
 0x125   : > { %2094 = vmatprep.subr.mxu1 %v923_v51 }
 0x126   : > { %2095 = vmatpush3.msra.mxu1 %v923_v51 }
 0x127   : > { %2096 = vmatprep.subr.mxu1 %v922_v52  ;;  %v2243_v58 = vpop.eup %2242 }
 0x128   : > { %2097 = vmatpush3.msra.mxu1 %v922_v52  ;;  %v917_v38 = vmul.f32 %v2243_v58, %v2687_v49  ;;  %v934_v49 = vld [vmem:[%s2917_s5 + $0x18] sm:$0xff]  ;;  %v986_v58 = vpop.permute.xlu1 %985 }
 0x129   : > { %2098 = vmatprep.subr.mxu1 %v921_v24  ;;  %v2245_v60 = vpop.eup %2244 }
 0x12a   : > { %2099 = vmatpush3.msra.mxu1 %v921_v24  ;;  %v916_v41 = vmul.f32 %v2245_v60, %v2691_v54  ;;  %v935_v54 = vld [vmem:[%s2917_s5 + $0x20] sm:$0xff]  ;;  %v991_v24 = vpop.permute.xlu0 %990 }
 0x12b   : > { %2100 = vmatprep.subr.mxu1 %v920_v30  ;;  %v2247_v61 = vpop.eup %2246 }
 0x12c   : > { %2101 = vmatpush3.msra.mxu1 %v920_v30  ;;  %v915_v62 = vmul.f32 %v2247_v61, %v2694_v63  ;;  %v936_v63 = vld [vmem:[%s2917_s5 + $0x28] sm:$0xff] }
 0x12d   : > { %2102 = vmatprep.subr.mxu1 %v919_v32 }
 0x12e   : > { %2103 = vmatpush3.msra.mxu1 %v919_v32 }
 0x12f   : > { %2104 = vmatprep.subr.mxu1 %v918_v35 }
 0x130   : > { %2105 = vmatpush3.msra.mxu1 %v918_v35 }
 0x131   : > { %2106 = vmatprep.subr.mxu1 %v917_v38 }
 0x132   : > { %2107 = vmatpush3.msra.mxu1 %v917_v38  ;;  %v981_v38 = vpop.permute.xlu0 %980 }
 0x133   : > { %2108 = vmatprep.subr.mxu1 %v916_v41 }
 0x134   : > { %2109 = vmatpush3.msra.mxu1 %v916_v41 }
 0x135   : > { %2110 = vmatprep.subr.mxu1 %v915_v62 }
 0x136   : > { %2111 = vmatpush3.msra.mxu1 %v915_v62 }
 0x137   : > { %2113 = vmatmul.mubr.f32.vlgmr.msra.gmra.mxu1 %v932_v40 }
 0x138   : > { %2115 = vmatprep.mubr.f32.mxu1 %v933_v43 }
 0x13b   : > { %2116 = vmatmul.mubr.f32.gmra.mxu1 %v934_v49 }
 0x13c   : > { %2118 = vmatprep.mubr.f32.mxu1 %v935_v54  ;;  %v976_v54 = vpop.permute.xlu1 %975 }
 0x13f   : > { %2119 = vmatmul.mubr.f32.gmra.mxu1 %v936_v63 }
 0x140   : > { %2121 = vmatprep.mubr.f32.mxu1 %v937_v0 }
 0x143   : > { %2122 = vmatmul.mubr.f32.gmra.mxu1 %v938_v1 }
 0x144   : > { %2124 = vmatprep.mubr.f32.mxu1 %v939_v2 }
 0x147   : > { %2125 = vmatmul.mubr.f32.gmra.mxu1 %v940_v57 }
 0x148   : > { %2127 = vmatprep.mubr.f32.mxu1 %v941_v3 }
 0x14b   : > { %2128 = vmatmul.mubr.f32.gmra.mxu1 %v942_v4 }
 0x14c   : > { %2130 = vmatprep.mubr.f32.mxu1 %v943_v5  ;;  %v971_v5 = vpop.permute.xlu0 %970 }
 0x14f   : > { %2131 = vmatmul.mubr.f32.gmra.mxu1 %v944_v6 }
 0x150   : > { %2133 = vmatprep.mubr.f32.mxu1 %v945_v59 }
 0x153   : > { %2134 = vmatmul.mubr.f32.gmra.mxu1 %v946_v7 }
 0x1f7   : > { %v2763_v9 = vpop.f32.mrf.mxu1 }
 0x1f8   : > { %v2809_v59 = vadd.f32 %v2763_v9, %v971_v5 }
 0x1f9   : > { %v2765_v11 = vpop.f32.mrf.mxu1 }
 0x1fa   : > { %v1940_v9 = vmul.f32 -1.442695, %v2809_v59 }
 0x1fb   : > { %v2117_v12 = vpop.f32.mrf.mxu1 }
 0x1fc   : > { %v2795_v62 = vadd.f32 %v2117_v12, %v981_v38 }
 0x1fd   : > { %v1119_v15 = vpop.f32.mrf.mxu1 }
 0x1fe   : > { %v1942_v0 = vmul.f32 -1.442695, %v2795_v62  ;;  %v2805_v57 = vadd.f32 %v1119_v15, %v976_v54 }
 0x1ff   : > { %v2120_v18 = vpop.f32.mrf.mxu1 }
 0x200   : > { %v2797_v40 = vadd.f32 %v2120_v18, %v991_v24  ;;  %v1941_v15 = vmul.f32 -1.442695, %v2805_v57 }
 0x201   : > { %v1129_v20 = vpop.f32.mrf.mxu1 }
 0x202   : > { %v2800_v49 = vadd.f32 %v1129_v20, %v986_v58  ;;  %v1944_v2 = vmul.f32 -1.442695, %v2797_v40 }
 0x203   : > { %v2123_v23 = vpop.f32.mrf.mxu1 }
 0x204   : > { %v2789_v35 = vadd.f32 %v2123_v23, %v1001_v22  ;;  %v1943_v3 = vmul.f32 -1.442695, %v2800_v49 }
 0x205   : > { %v1139_v26 = vpop.f32.mrf.mxu1 }
 0x206   : > { %v2792_v61 = vadd.f32 %v1139_v26, %v996_v19  ;;  %v1946_v43 = vmul.f32 -1.442695, %v2789_v35 }
 0x207   : > { %v2126_v27 = vpop.f32.mrf.mxu1 }
 0x208   : > { %v2783_v55 = vadd.f32 %v2126_v27, %v1011_v33  ;;  %v1945_v63 = vmul.f32 -1.442695, %v2792_v61 }
 0x209   : > { %v1149_v31 = vpop.f32.mrf.mxu1 }
 0x20a   : > { %v2786_v56 = vadd.f32 %v1149_v31, %v1006_v37  ;;  %v1948_v60 = vmul.f32 -1.442695, %v2783_v55 }
 0x20b   : > { %v2129_v34 = vpop.f32.mrf.mxu1 }
 0x20c   : > { %v2769_v28 = vadd.f32 %v2129_v34, %v1021_v25  ;;  %v1947_v41 = vmul.f32 -1.442695, %v2786_v56 }
 0x20d   : > { %v1159_v36 = vpop.f32.mrf.mxu1 }
 0x20e   : > { %v2777_v50 = vadd.f32 %v1159_v36, %v1016_v29  ;;  %v1950_v17 = vmul.f32 -1.442695, %v2769_v28 }
 0x20f   : > { %v2132_v39 = vpop.f32.mrf.mxu1 }
 0x210   : > { %v2767_v42 = vadd.f32 %v2132_v39, %v1031_v16  ;;  %v1949_v32 = vmul.f32 -1.442695, %v2777_v50 }
 0x211   : > { %v1169_v44 = vpop.f32.mrf.mxu1 }
 0x212   : > { %v1952_v45 = vmul.f32 -1.442695, %v2767_v42  ;;  %v2772_v46 = vadd.f32 %v1169_v44, %v1026_v21 }
 0x213   : > { %v2135_v47 = vpop.f32.mrf.mxu1 }
 0x214   : > { %v1951_v14 = vmul.f32 -1.442695, %v2772_v46  ;;  %v2775_v48 = vadd.f32 %v2135_v47, %v1041_v10  ;;  %2248 = vpow2.f32 %v1952_v45  ;;  %v966_v10 = vpop.permute.xlu1 %965 }
 0x215   : > { %v1179_v51 = vpop.f32.mrf.mxu1  ;;  %v2812_v16 = vadd.f32 %v2765_v11, %v966_v10 }
 0x216   : > { %v1954_v52 = vmul.f32 -1.442695, %v2775_v48  ;;  %v2781_v53 = vadd.f32 %v1179_v51, %v1036_v13  ;;  %2250 = vpow2.f32 %v1951_v14 }
 0x217   : > { %v1939_v26 = vmul.f32 -1.442695, %v2812_v16 }
 0x218   : > { %v1953_v30 = vmul.f32 -1.442695, %v2781_v53  ;;  %2252 = vpow2.f32 %v1954_v52 }
 0x219   : > { %2254 = vpow2.f32 %v1950_v17 }
 0x21a   : > { %2256 = vpow2.f32 %v1953_v30 }
 0x21b   : > { %2258 = vpow2.f32 %v1949_v32 }
 0x21c   : > { %2260 = vpow2.f32 %v1948_v60 }
 0x21d   : > { %2262 = vpow2.f32 %v1947_v41 }
 0x21e   : > { %2264 = vpow2.f32 %v1946_v43 }
 0x21f   : > { %2266 = vpow2.f32 %v1945_v63 }
 0x220   : > { %2268 = vpow2.f32 %v1942_v0 }
 0x221   : > { %v2249_v1 = vpop.eup %2248  ;;  %2270 = vpow2.f32 %v1944_v2 }
 0x222   : > { %v1249_v7 = vadd.f32 1.0, %v2249_v1  ;;  %2272 = vpow2.f32 %v1943_v3  ;;  %v1389_v3 = vlaneseq }
 0x223   : > { %v2251_v4 = vpop.eup %2250 }
 0x224   : > { %v1248_v18 = vadd.f32 1.0, %v2251_v4  ;;  %vm1831_vm8 = vcmp.lt.s32.totalorder %v1389_v3, 256 }
 0x225   : > { %v2253_v6 = vpop.eup %2252 }
 0x226   : > { %v2255_v8 = vpop.eup %2254  ;;  %v1251_v12 = vadd.f32 1.0, %v2253_v6  ;;  %v2831_v6 = vshrl.u32 %v1389_v3, 7 }
 0x227   : > { %v2257_v13 = vpop.eup %2256  ;;  %v1247_v23 = vadd.f32 1.0, %v2255_v8 }
 0x228   : > { %2274 = vrcp.f32 %v1251_v12  ;;  %v1250_v20 = vadd.f32 1.0, %v2257_v13  ;;  %v2259_v21 = vpop.eup %2258  ;;  %v1403_v12 = vld [vmem:[%s504_s27] sm:$0x3]  ;;  %v2841_v13 = vsub.s32 0, %v2831_v6 }
 0x229   : > { %2276 = vrcp.f32 %v1249_v7  ;;  %v2261_v25 = vpop.eup %2260  ;;  %v1246_v27 = vadd.f32 1.0, %v2259_v21 }
 0x22a   : > { %2278 = vrcp.f32 %v1250_v20  ;;  %v2263_v11 = vpop.eup %2262  ;;  %v1245_v29 = vadd.f32 1.0, %v2261_v25  ;;  %v1409_v21 = vrot.slane %v1403_v12, %v2841_v13  ;;  %v1301_v25 = vld [vmem:[%s2919_s7 + $0x8] sm:$0xff] }
 0x22b   : > { %2280 = vpow2.f32 %v1941_v15  ;;  %v2265_v31 = vpop.eup %2264  ;;  %v1244_v33 = vadd.f32 1.0, %v2263_v11  ;;  %v1390_v11 = vand.u32 127, %v1389_v3 }
 0x22c   : > { %2282 = vrcp.f32 %v1248_v18  ;;  %v2267_v34 = vpop.eup %2266  ;;  %v1243_v37 = vadd.f32 1.0, %v2265_v31  ;;  %vm1414_vm2 = vcmp.eq.s32.totalorder %v2831_v6, %v1409_v21  ;;  %v1312_v31 = vpop.permute.xlu0 %1311 }
 0x22d   : > { %2284 = vpow2.f32 %v1940_v9  ;;  %v2269_v36 = vpop.eup %2268  ;;  %v1242_v44 = vadd.f32 1.0, %v2267_v34 }
 0x22e   : > { %2286 = vrcp.f32 %v1247_v23  ;;  %v2271_v39 = vpop.eup %2270  ;;  %v1239_v58 = vadd.f32 1.0, %v2269_v36  ;;  %v1307_v36 = vpop.permute.xlu1 %1306 }
 0x22f   : > { %2288 = vpow2.f32 %v1939_v26  ;;  %v2273_v22 = vpop.eup %2272  ;;  %v1241_v14 = vadd.f32 1.0, %v2271_v39 }
 0x230   : > { %2290 = vrcp.f32 %v1246_v27  ;;  %v1240_v52 = vadd.f32 1.0, %v2273_v22  ;;  %v1421_v27 = vld [vmem:[%s2921_s9 + $0x8] sm:$0xff] }
 0x231   : > { %2292 = vrcp.f32 %v1245_v29  ;;  %v1391_v29 = vstv %s2460_s21 }
 0x232   : > { %2294 = vrcp.f32 %v1244_v33  ;;  %vm1392_vm5 = vcmp.eq.s32.totalorder %v1390_v11, %v1391_v29 }
 0x233   : > { %2296 = vrcp.f32 %v1243_v37 }
 0x234   : > { %2298 = vrcp.f32 %v1242_v44 }
 0x235   : > { %v2275_v45 = vpop.eup %2274  ;;  %2300 = vrcp.f32 %v1241_v14  ;;  %v1422_v14 = vld [vmem:[%s2922_s10] sm:$0xff] }
 0x236   : > { %v2277_v47 = vpop.eup %2276  ;;  %v1299_v19 = vmul.f32 %v2275_v45, %v2775_v48  ;;  %2302 = vrcp.f32 %v1240_v52  ;;  %v1727_v52 = vld [vmem:[#allocation2] sm:$0x1] }
 0x237   : > { %v2279_v51 = vpop.eup %2278  ;;  %v1297_v60 = vmul.f32 %v2277_v47, %v2767_v42  ;;  %2304 = vrcp.f32 %v1239_v58 }
 0x238   : > { %v2281_v17 = vpop.eup %2280  ;;  %v1298_v24 = vmul.f32 %v2279_v51, %v2781_v53  ;;  %2136 = vmatprep.subr.mxu0 %v1299_v19  ;;  %v1602_v51 = vld [vmem:[%s2924_s12] sm:$0xff] }
 0x239   : > { %v2283_v30 = vpop.eup %2282  ;;  %2137 = vmatpush3.msra.mxu0 %v1299_v19  ;;  %v1238_v48 = vadd.f32 1.0, %v2281_v17  ;;  %v1423_v19 = vld [vmem:[%s2922_s10 + $0x8] sm:$0xff] }
 0x23a   : > { %v2285_v32 = vpop.eup %2284  ;;  %2138 = vmatprep.subr.mxu0 %v1298_v24  ;;  %v1296_v43 = vmul.f32 %v2283_v30, %v2772_v46  ;;  %v1603_v17 = vld [vmem:[%s2924_s12 + $0x8] sm:$0xff]  ;;  %v1402_v30 = vld [vmem:[%s500_s30] sm:$0x3] }
 0x23b   : > { %v2287_v38 = vpop.eup %2286  ;;  %2139 = vmatpush3.msra.mxu0 %v1298_v24  ;;  %v1237_v54 = vadd.f32 1.0, %v2285_v32  ;;  %2306 = vrcp.f32 %v1238_v48 }
 0x23c   : > { %v2289_v41 = vpop.eup %2288  ;;  %2140 = vmatprep.subr.mxu0 %v1297_v60  ;;  %v1295_v63 = vmul.f32 %v2287_v38, %v2769_v28 }
 0x23d   : > { %v2291_v53 = vpop.eup %2290  ;;  %2141 = vmatpush3.msra.mxu0 %v1297_v60  ;;  %v1236_v42 = vadd.f32 1.0, %v2289_v41  ;;  %2308 = vrcp.f32 %v1237_v54  ;;  %v1438_v60 = vrot.slane %v1402_v30, %v2841_v13 }
 0x23e   : > { %2142 = vmatprep.subr.mxu0 %v1296_v43  ;;  %v2293_v0 = vpop.eup %2292  ;;  %v1294_v1 = vmul.f32 %v2291_v53, %v2777_v50 }
 0x23f   : > { %2143 = vmatpush3.msra.mxu0 %v1296_v43  ;;  %v2295_v2 = vpop.eup %2294  ;;  %v1293_v46 = vmul.f32 %v2293_v0, %v2783_v55  ;;  %2310 = vrcp.f32 %v1236_v42 }
 0x240   : > { %2144 = vmatprep.subr.mxu0 %v1295_v63  ;;  %v2297_v4 = vpop.eup %2296  ;;  %v1292_v28 = vmul.f32 %v2295_v2, %v2786_v56 }
 0x241   : > { %2145 = vmatpush3.msra.mxu0 %v1295_v63  ;;  %v2299_v5 = vpop.eup %2298  ;;  %v1291_v50 = vmul.f32 %v2297_v4, %v2789_v35  ;;  %v1412_v35 = vsub.s32 1, %v2831_v6 }
 0x242   : > { %2146 = vmatprep.subr.mxu0 %v1294_v1  ;;  %v2301_v55 = vpop.eup %2300  ;;  %v1290_v7 = vmul.f32 %v2299_v5, %v2792_v61 }
 0x243   : > { %2147 = vmatpush3.msra.mxu0 %v1294_v1  ;;  %v2303_v56 = vpop.eup %2302  ;;  %v1289_v8 = vmul.f32 %v2301_v55, %v2797_v40  ;;  %v1413_v40 = vrot.slane %v1403_v12, %v1412_v35  ;;  %v1442_v38 = vrot.slane %v1402_v30, %v1412_v35 }
 0x244   : > { %2148 = vmatprep.subr.mxu0 %v1293_v46  ;;  %v2305_v10 = vpop.eup %2304  ;;  %v1288_v61 = vmul.f32 %v2303_v56, %v2800_v49 }
 0x245   : > { %2149 = vmatpush3.msra.mxu0 %v1293_v46  ;;  %v1287_v18 = vmul.f32 %v2305_v10, %v2795_v62  ;;  %vm1415_vm1 = vcmp.eq.s32.totalorder %v2831_v6, %v1413_v40 }
 0x246   : > { %2150 = vmatprep.subr.mxu0 %v1292_v28 }
 0x247   : > { %2151 = vmatpush3.msra.mxu0 %v1292_v28 }
 0x248   : > { %2152 = vmatprep.subr.mxu0 %v1291_v50  ;;  %v2307_v15 = vpop.eup %2306 }
 0x249   : > { %2153 = vmatpush3.msra.mxu0 %v1291_v50  ;;  %v1286_v9 = vmul.f32 %v2307_v15, %v2805_v57  ;;  %v2369_v57 = vmov 0.0  }
 0x24a   : > { %2154 = vmatprep.subr.mxu0 %v1290_v7  ;;  %v2309_v20 = vpop.eup %2308  ;;  %v1956_v26 = vsel %vm1415_vm1, 1.0, %v2369_v57 }
 0x24b   : > { %2155 = vmatpush3.msra.mxu0 %v1290_v7  ;;  %v1285_v49 = vmul.f32 %v2309_v20, %v2809_v59  ;;  %v1955_v59 = vsel %vm1414_vm2, 1.0, %v2369_v57 }
 0x24c   : > { %2156 = vmatprep.subr.mxu0 %v1289_v8  ;;  %v2311_v23 = vpop.eup %2310 }
 0x24d   : > { %2157 = vmatpush3.msra.mxu0 %v1289_v8  ;;  %v1284_v62 = vmul.f32 %v2311_v23, %v2812_v16  ;;  %v1420_v16 = vld [vmem:[%s2921_s9] sm:$0xff] }
 0x24e   : > { %2158 = vmatprep.subr.mxu0 %v1288_v61 }
 0x24f   : > { %2159 = vmatpush3.msra.mxu0 %v1288_v61 }
 0x250   : > { %2160 = vmatprep.subr.mxu0 %v1287_v18 }
 0x251   : > { %2161 = vmatpush3.msra.mxu0 %v1287_v18 }
 0x252   : > { %2162 = vmatprep.subr.mxu0 %v1286_v9 }
 0x253   : > { %2163 = vmatpush3.msra.mxu0 %v1286_v9 }
 0x254   : > { %2164 = vmatprep.subr.mxu0 %v1285_v49 }
 0x255   : > { %2165 = vmatpush3.msra.mxu0 %v1285_v49 }
 0x256   : > { %2166 = vmatprep.subr.mxu0 %v1284_v62 }
 0x257   : > { %2167 = vmatpush3.msra.mxu0 %v1284_v62 }
 0x258   : > { %2169 = vmatmul.mubr.f32.vlgmr.msra.gmra.mxu0 %v1301_v25  ;;  %1957 = vmatprep.subr.msk.mxu0 %vm1456_vm3, %v1956_v26 }
 0x259   : > { %1958 = vmatpush1.msk.msra.mxu0 %vm1456_vm3, %v1955_v59  ;;  %1527 = vmatprep.mubr.f32.mxu0 %v2369_v57 }
 0x25c   : > { %1959 = vmatmul.mubr.msk.f32.vlgmr.msra.gmra.mxu0 %vm1449_vm4, %v1420_v16 }
 0x25d   : > { %1533 = vmatprep.mubr.f32.mxu0 %v2369_v57 }
 0x260   : > { %1960 = vmatmul.mubr.msk.f32.gmra.mxu0 %vm1449_vm4, %v1421_v27 }
 0x261   : > { %1685 = vmatprep.mubr.f32.mxu0 %v2369_v57 }
 0x318   : > { %v2170_v33 = vpop.f32.mrf.mxu0 }
 0x319   : > { %v1386_v34 = vadd.f32 %v2170_v33, %v1312_v31 }
 0x31a   : > { %v1380_v37 = vpop.f32.mrf.mxu0 }
 0x31b   : > { %v1381_v39 = vadd.f32 %v1380_v37, %v1307_v36  ;;  %v1394_v22 = vsel %vm1392_vm5, %v1386_v34, 0.0 }
 0x31c   : > { %v1399_v44 = vsel %vm1395_vm6, %v1394_v22, 0.0  ;;  %v1529_v24 = vpop.f32.mrf.mxu0 }
 0x31d   : > { %1400 = vadd.xlane.f32.xlu0 %v1399_v44  ;;  %v1393_v45 = vsel %vm1392_vm5, %v1381_v39, 0.0 }
 0x31e   : > { %v1396_v47 = vsel %vm1395_vm6, %v1393_v45, 0.0  ;;  %v1531_v58 = vpop.f32.mrf.mxu0 }
 0x31f   : > { %1397 = vadd.xlane.f32.xlu1 %v1396_v47 }
 0x320   : > { %v1535_v43 = vpop.f32.mrf.mxu0 }
 0x322   : > { %v1537_v46 = vpop.f32.mrf.mxu0 }
 0x330   : > { %1426 = vperm.xlu1 %2183, %v1422_v14  }
 0x333   : > { %1431 = vperm.xlu0 %2182, %v1423_v19  }
 0x334   : > { %1606 = vperm.xlu1 %2183, %v1602_v51  }
 0x337   : > { %1611 = vperm.xlu0 %2182, %v1603_v17  }
 0x33b   : > { %1730 = vperm.xlu0 %2182, %v1727_v52  }
 0x3a6   : > { %v1401_v41 = vpop.xlane.xlu0 %1400 }
 0x3a8   : > { %v1398_v32 = vpop.xlane.xlu1 %1397 }
 0x3ac   : > { %v1427_v48 = vpop.permute.xlu1 %1426 }
 0x3ad   : > { %v1445_v53 = vmul.f32 %v1438_v60, %v1427_v48  ;;  %v1446_v54 = vmul.f32 %v1442_v38, %v1427_v48 }
 0x3ae   : > { %v1432_v63 = vpop.permute.xlu0 %1431 }
 0x3af   : > { %v1530_v0 = vadd.f32 %v1529_v24, %v1445_v53  ;;  %v1532_v42 = vadd.f32 %v1531_v58, %v1446_v54  ;;  %v1447_v1 = vmul.f32 %v1438_v60, %v1432_v63  ;;  %v1448_v2 = vmul.f32 %v1442_v38, %v1432_v63  ;;  %v1600_v58 = vld [vmem:[%s2923_s11] sm:$0xff]  ;;  %v1601_v60 = vld [vmem:[%s2923_s11 + $0x8] sm:$0xff] }
 0x3b0   : > { %v1607_v38 = vpop.permute.xlu1 %1606 }
 0x3b1   : > { %v1540_v4 = vadd.f32 %v1530_v0, %v1398_v32  ;;  %v1541_v28 = vadd.f32 %v1532_v42, %v1398_v32  ;;  %v1536_v5 = vadd.f32 %v1535_v43, %v1447_v1  ;;  %v1538_v50 = vadd.f32 %v1537_v46, %v1448_v2 }
 0x3b2   : > { %v1612_v54 = vpop.permute.xlu0 %1611 }
 0x3b3   : > { %v1961_v55 = vmul.f32 -1.442695, %v1540_v4  ;;  %v1962_v7 = vmul.f32 -1.442695, %v1541_v28  ;;  %v1542_v56 = vadd.f32 %v1536_v5, %v1401_v41  ;;  %v1543_v8 = vadd.f32 %v1538_v50, %v1401_v41 }
 0x3b5   : > { %2312 = vpow2.f32 %v1961_v55  ;;  %v1963_v35 = vmul.f32 -1.442695, %v1542_v56  ;;  %v1964_v10 = vmul.f32 -1.442695, %v1543_v8 }
 0x3b6   : > { %2314 = vpow2.f32 %v1962_v7 }
 0x3b7   : > { %2316 = vpow2.f32 %v1963_v35 }
 0x3b8   : > { %2318 = vpow2.f32 %v1964_v10 }
 0x3c2   : > { %v2313_v12 = vpop.eup %2312 }
 0x3c3   : > { %v2315_v61 = vpop.eup %2314  ;;  %v1556_v15 = vadd.f32 1.0, %v2313_v12 }
 0x3c4   : > { %v2317_v18 = vpop.eup %2316  ;;  %v1557_v40 = vadd.f32 1.0, %v2315_v61 }
 0x3c5   : > { %v2319_v20 = vpop.eup %2318  ;;  %2320 = vrcp.f32 %v1556_v15  ;;  %v1558_v21 = vadd.f32 1.0, %v2317_v18 }
 0x3c6   : > { %2322 = vrcp.f32 %v1557_v40  ;;  %v1559_v9 = vadd.f32 1.0, %v2319_v20 }
 0x3c7   : > { %2324 = vrcp.f32 %v1558_v21 }
 0x3c8   : > { %2326 = vrcp.f32 %v1559_v9  ;;  %v1726_v9 = vld [vmem:[%s2925_s13] sm:$0x1] }
 0x3d2   : > { %v2321_v23 = vpop.eup %2320 }
 0x3d3   : > { %v2323_v49 = vpop.eup %2322  ;;  %v1568_v62 = vmul.f32 %v2321_v23, %v1540_v4  ;;  %v2370_v23 = vmov 1966171168  }
 0x3d4   : > { %v2325_v25 = vpop.eup %2324  ;;  %v1569_v26 = vmul.f32 %v2323_v49, %v1541_v28  ;;  %v1815_v49 = vunpack.c.l.s4 %v2370_v23 }
 0x3d5   : > { %v2327_v59 = vpop.eup %2326  ;;  %v1965_v16 = vmul.f32 -1.442695, %v1568_v62  ;;  %v1570_v27 = vmul.f32 %v2325_v25, %v1542_v56 }
 0x3d6   : > { %v1571_v11 = vmul.f32 %v2327_v59, %v1543_v8  ;;  %v1966_v29 = vmul.f32 -1.442695, %v1569_v26  ;;  %v1816_v25 = vunpack.c.0.s8 %v1815_v49 }
 0x3d7   : > { %2328 = vpow2.f32 %v1965_v16  ;;  %v1967_v31 = vmul.f32 -1.442695, %v1570_v27 }
 0x3d8   : > { %v1968_v33 = vmul.f32 -1.442695, %v1571_v11  ;;  %2330 = vpow2.f32 %v1966_v29  ;;  %v1819_v29 = vsub.s32 %v1816_v25, %v2831_v6 }
 0x3d9   : > { %2332 = vpow2.f32 %v1967_v31 }
 0x3da   : > { %2334 = vpow2.f32 %v1968_v33 }
 0x3e4   : > { %v2329_v34 = vpop.eup %2328 }
 0x3e5   : > { %v2331_v36 = vpop.eup %2330  ;;  %v1584_v44 = vadd.f32 1.0, %v2329_v34 }
 0x3e6   : > { %v2333_v37 = vpop.eup %2332  ;;  %v1585_v39 = vadd.f32 1.0, %v2331_v36 }
 0x3e7   : > { %v2335_v22 = vpop.eup %2334  ;;  %v1586_v45 = vadd.f32 1.0, %v2333_v37 }
 0x3e8   : > { %v1587_v47 = vadd.f32 1.0, %v2335_v22  ;;  %2336 = vrcp.f32 %v1585_v39 }
 0x3e9   : > { %2338 = vrcp.f32 %v1586_v45 }
 0x3ea   : > { %2340 = vrcp.f32 %v1587_v47 }
 0x3eb   : > { %2342 = vrcp.f32 %v1584_v44 }
 0x3f5   : > { %v2337_v14 = vpop.eup %2336 }
 0x3f6   : > { %v2339_v19 = vpop.eup %2338  ;;  %v1597_v30 = vmul.f32 %v2337_v14, %v1569_v26 }
 0x3f7   : > { %v2341_v51 = vpop.eup %2340  ;;  %v1598_v17 = vmul.f32 %v2339_v19, %v1570_v27 }
 0x3f8   : > { %v2343_v52 = vpop.eup %2342  ;;  %v1599_v24 = vmul.f32 %v2341_v51, %v1571_v11 }
 0x3f9   : > { %v1596_v32 = vmul.f32 %v2343_v52, %v1568_v62  ;;  %v1731_v62 = vpop.permute.xlu0 %1730 }
 0x3fa   : > { %1649 = vmatprep.subr.mxu0 %v1599_v24  ;;  %v1736_v59 = vrot.slane %v1731_v62, %v2841_v13 }
 0x3fb   : > { %1650 = vmatpush1.msra.mxu0 %v1598_v17 }
 0x3fc   : > { %1651 = vmatprep.subr.mxu0 %v1597_v30 }
 0x3fd   : > { %1652 = vmatpush1.msra.mxu0 %v1596_v32 }
 0x3fe   : > { %1969 = vmatmul.mubr.msk.f32.vlgmr.msra.gmra.mxu0 %vm1614_vm7, %v1600_v58 }
 0x3ff   : > { %1691 = vmatprep.mubr.f32.mxu0 %v2369_v57 }
 0x402   : > { %1970 = vmatmul.mubr.msk.f32.gmra.mxu0 %vm1614_vm7, %v1601_v60 }
 0x403   : > { %1804 = vmatprep.mubr.f32.mxu0 %v2369_v57 }
 0x4be   : > { %v1687_v41 = vpop.f32.mrf.mxu0 }
 0x4bf   : > { %v1688_v48 = vadd.f32 %v1687_v41, %v1607_v38 }
 0x4c0   : > { %v1689_v43 = vpop.f32.mrf.mxu0 }
 0x4c1   : > { %v1690_v53 = vadd.f32 %v1689_v43, %v1607_v38  ;;  %v1971_v63 = vmul.f32 -1.442695, %v1688_v48 }
 0x4c2   : > { %v1693_v0 = vpop.f32.mrf.mxu0 }
 0x4c3   : > { %v1972_v42 = vmul.f32 -1.442695, %v1690_v53  ;;  %v1694_v1 = vadd.f32 %v1693_v0, %v1612_v54 }
 0x4c4   : > { %v1695_v2 = vpop.f32.mrf.mxu0 }
 0x4c5   : > { %2344 = vpow2.f32 %v1972_v42  ;;  %v1973_v46 = vmul.f32 -1.442695, %v1694_v1  ;;  %v1696_v4 = vadd.f32 %v1695_v2, %v1612_v54 }
 0x4c6   : > { %2346 = vpow2.f32 %v1971_v63 }
 0x4c7   : > { %2348 = vpow2.f32 %v1973_v46  ;;  %v1974_v28 = vmul.f32 -1.442695, %v1696_v4 }
 0x4c9   : > { %2350 = vpow2.f32 %v1974_v28 }
 0x4d2   : > { %v2345_v5 = vpop.eup %2344 }
 0x4d3   : > { %v2347_v57 = vpop.eup %2346  ;;  %v1711_v50 = vadd.f32 1.0, %v2345_v5 }
 0x4d4   : > { %v2349_v55 = vpop.eup %2348  ;;  %v1710_v8 = vadd.f32 1.0, %v2347_v57 }
 0x4d5   : > { %v1712_v7 = vadd.f32 1.0, %v2349_v55  ;;  %2352 = vrcp.f32 %v1711_v50 }
 0x4d6   : > { %v2351_v56 = vpop.eup %2350 }
 0x4d7   : > { %v1713_v35 = vadd.f32 1.0, %v2351_v56  ;;  %2354 = vrcp.f32 %v1712_v7 }
 0x4d9   : > { %2356 = vrcp.f32 %v1713_v35 }
 0x4da   : > { %2358 = vrcp.f32 %v1710_v8 }
 0x4e2   : > { %v2353_v10 = vpop.eup %2352 }
 0x4e3   : > { %v1723_v20 = vmul.f32 %v2353_v10, %v1690_v53 }
 0x4e4   : > { %v2355_v12 = vpop.eup %2354 }
 0x4e5   : > { %v1724_v40 = vmul.f32 %v2355_v12, %v1694_v1 }
 0x4e6   : > { %v2357_v61 = vpop.eup %2356 }
 0x4e7   : > { %v2359_v15 = vpop.eup %2358  ;;  %v1725_v18 = vmul.f32 %v2357_v61, %v1696_v4 }
 0x4e8   : > { %v1722_v21 = vmul.f32 %v2359_v15, %v1688_v48 }
 0x4e9   : > { %1768 = vmatprep.subr.mxu0 %v1725_v18 }
 0x4ea   : > { %1769 = vmatpush1.msra.mxu0 %v1724_v40 }
 0x4eb   : > { %1770 = vmatprep.subr.mxu0 %v1723_v20 }
 0x4ec   : > { %1771 = vmatpush1.msra.mxu0 %v1722_v21 }
 0x4ed   : > { %1975 = vmatmul.mubr.msk.f32.vlgmr.msra.gmra.mxu0 %vm1614_vm7, %v1726_v9 }
 0x5ad   : > { %v1806_v26 = vpop.f32.mrf.mxu0 }
 0x5ae   : > { %v1807_v27 = vadd.f32 %v1806_v26, %v1736_v59 }
 0x5af   : > { %v1808_v16 = vpop.f32.mrf.mxu0 }
 0x5b0   : > { %v1809_v11 = vadd.f32 %v1808_v16, %v1736_v59 }
 0x5b2   : > { %v1813_v31 = vcombine.low %v1807_v27, %v1809_v11 }
 0x5b4   : > { %v1820_v33 = vrot.slane %v1813_v31, %v1819_v29 }
 0x5b6   : > { %v1827_v34 = vrot.slane %v1820_v33, %v1819_v29 }
 0x5b8   : > { %1833 = vst.msk [vmem:[%s508_s25] sm:$0x3] %vm1831_vm8, %v1827_v34 }
 0x5b9 PF: > { %s27_s20 = sadd.s32 1, %s2366_s20  }
 0x5ba   : > { %p24_p4 = scmp.ge.s32.totalorder %s27_s20, 4  }
 0x5bc   :  { %26 = sbr.rel (!%p24_p4) target bundleno = 3 (0x3), region = 113 }

</bundles_post_ra>
